<compile_context>
chip_gen: v6e
topology: v6e:2x2x1
jax: 0.10.0
libtpu: 0.0.40
codegen_flags: <defaults>
</compile_context>

<pallas_src>
import jax
import jax.numpy as jnp
from jax.experimental import pallas as pl
from jax.experimental.pallas import tpu as pltpu


# --------------------------------------------------------------------------
# Fused encoder + discriminator kernel (single invocation, everything in VMEM)
# --------------------------------------------------------------------------
def _encoder_disc_kernel(xp_ref, wih_ref, whh_ref, bgx_ref, bhn_ref,
                         w1_ref, b1_ref, w2_ref, b2_ref, w3_ref, b3_ref,
                         ctx_ref, logits_ref):
    """Fused-direction bidirectional GRU + DIAYN discriminator MLP.

    xp_ref   : (T*Bp, 2E) bf16  paired inputs: row (t,b) = [x(t,b) | x(T-1-t,b)]
    wih_ref  : (2E, 6H)  bf16   block input weights, gate cols [r_f r_b|z_f z_b|n_f n_b]
    whh_ref  : (2H, 6H)  bf16   block-diagonal hidden weights, same gate layout
    bgx_ref  : (1, 6H)   f32    b_ih (+ b_hr, b_hz folded) in the gate-grouped layout
    bhn_ref  : (1, 2H)   f32    hidden n-gate bias [fwd | bwd]  (stays under r⊙)
    w1_ref   : (2H, DHP) f32    disc layer-1 weights restricted to encoder feats
    b1_ref   : (1, DHP)  f32    disc layer-1 bias with skill one-hot row folded in
    w2_ref   : (DHP, DHP) f32
    b2_ref   : (1, DHP)  f32
    w3_ref   : (DHP, LOGP) f32  logits padded to 128 lanes
    b3_ref   : (1, LOGP) f32
    ctx_ref    : out (T*Bp, 2H)  encoder context rows, fwd ‖ bwd (lane-dense)
    logits_ref : out (Bp, LOGP)  padded discriminator logits
    """
    TB, two_h = ctx_ref.shape
    H = two_h // 2
    Bp = logits_ref.shape[0]
    T = TB // Bp

    # --- (1) Hoisted input projection: one MXU matmul for both directions,
    #         all gate biases except b_hn already folded into bgx. -------------
    gx = jnp.dot(xp_ref[...], wih_ref[...],
                 preferred_element_type=jnp.float32) + bgx_ref[...]   # (T*Bp, 6H) f32

    whh = whh_ref[...]                                                # (2H, 6H) bf16
    bhn = jnp.broadcast_to(bhn_ref[...], (Bp, two_h))                 # hoisted broadcast

    # --- (2) Fused-direction recurrence on a single (Bp, 128) carry. ----------
    h = jnp.zeros((Bp, two_h), jnp.float32)                           # [h_f | h_b]
    hs = []
    # T is a trace-time constant -> fully unrolled; scheduler sees all steps.
    for i in range(T):
        gxi = gx[i * Bp:(i + 1) * Bp]                                 # (Bp, 6H)
        gh = jnp.dot(h.astype(jnp.bfloat16), whh,
                     preferred_element_type=jnp.float32)              # (Bp, 6H)
        # PyTorch nn.GRU: r = σ(gx_r + gh_r); z = σ(gx_z + gh_z);
        #                 n = tanh(gx_n + r ⊙ (gh_n + b_hn)); h' = (1 − z) n + z h
        r = jax.nn.sigmoid(gxi[:, 0:two_h] + gh[:, 0:two_h])
        z = jax.nn.sigmoid(gxi[:, two_h:2 * two_h] + gh[:, two_h:2 * two_h])
        n = jnp.tanh(gxi[:, 2 * two_h:3 * two_h]
                     + r * (gh[:, 2 * two_h:3 * two_h] + bhn))
        h = (1.0 - z) * n + z * h
        hs.append(h)

    # --- (3) Single lane-dense ctx writeback after the recurrence. ------------
    # ctx[t] = [h_f(t) | h_b(t)] ; h_b(t) was produced at iteration T-1-t.
    lane = jax.lax.broadcasted_iota(jnp.int32, (Bp, two_h), 1)
    fwd_mask = lane < H
    ctx_rows = [jnp.where(fwd_mask, hs[t], hs[T - 1 - t]) for t in range(T)]
    ctx_ref[...] = jnp.concatenate(ctx_rows, axis=0).astype(ctx_ref.dtype)

    # --- (4) Mean-pooled encoder features: sum over iterations is already
    #         [Σ h_f | Σ h_b] because both directions sweep all time steps. ----
    acc = hs[0]
    for t in range(1, T):
        acc = acc + hs[t]
    feats = acc * (1.0 / T)                                           # (Bp, 2H)

    # --- (5) DIAYN discriminator MLP (full-lane padded; zero-pad part of the
    #         840-dim state skipped, skill one-hot folded into b1). ------------
    h1 = jnp.maximum(
        jnp.dot(feats, w1_ref[...], preferred_element_type=jnp.float32)
        + b1_ref[...], 0.0)
    h2 = jnp.maximum(
        jnp.dot(h1, w2_ref[...], preferred_element_type=jnp.float32)
        + b2_ref[...], 0.0)
    logits_ref[...] = (
        jnp.dot(h2, w3_ref[...], preferred_element_type=jnp.float32)
        + b3_ref[...]).astype(logits_ref.dtype)


def encode_and_discriminate(xp, T, Bp, two_h, wih_block, whh_cat, bgx, bhn,
                            w1p, b1p, w2p, b2p, w3p, b3p):
    LOGP = w3p.shape[1]
    ctx_flat, logits_pad = pl.pallas_call(
        _encoder_disc_kernel,
        out_shape=(jax.ShapeDtypeStruct((T * Bp, two_h), jnp.float32),
                   jax.ShapeDtypeStruct((Bp, LOGP), jnp.float32)),
        compiler_params=pltpu.CompilerParams(vmem_limit_bytes=32 * 1024 * 1024),
    )(xp, wih_block, whh_cat, bgx, bhn, w1p, b1p, w2p, b2p, w3p, b3p)
    return ctx_flat, logits_pad


# --------------------------------------------------------------------------
# Parameter construction (deterministic, Xavier-ish scaling)
# --------------------------------------------------------------------------
def make_params(key, V, E, H, state_size, disc_hidden, n_skills):
    ks = jax.random.split(key, 8)

    def init(k, shape, fan_in):
        return jax.random.normal(k, shape, jnp.float32) / jnp.sqrt(float(fan_in))

    emb = init(ks[0], (V, E), E).at[0].set(0.0)     # padding_idx=0 row zeroed

    # Per-direction fused 3-gate GRU weights [fwd, bwd]; gates (r, z, n) along 3H
    # (PyTorch nn.GRU gate order).
    wih = init(ks[1], (2, E, 3 * H), E)
    whh = init(ks[2], (2, H, 3 * H), H)
    bih = init(ks[3], (2, 1, 3 * H), H)
    bhh = init(ks[4], (2, 1, 3 * H), H)
    gru = (wih, whh, bih, bhh)

    w1 = init(ks[5], (state_size, disc_hidden), state_size)
    b1 = jnp.zeros((1, disc_hidden), jnp.float32)
    w2 = init(ks[6], (disc_hidden, disc_hidden), disc_hidden)
    b2 = jnp.zeros((1, disc_hidden), jnp.float32)
    w3 = init(ks[7], (disc_hidden, n_skills), disc_hidden)
    b3 = jnp.zeros((1, n_skills), jnp.float32)
    disc = (w1, b1, w2, b2, w3, b3)
    return emb, gru, disc


def _round_up(x, m):
    return ((x + m - 1) // m) * m


# --------------------------------------------------------------------------
# DIAYN_Agent.forward equivalent
# --------------------------------------------------------------------------
def diayn_agent_forward(tokens, emb, gru, disc,
                        state_size=840, n_skills=4, skill_id=0):
    wih, whh, bih, bhh = gru
    w1, b1, w2, b2, w3, b3 = disc
    T, B = tokens.shape
    E = emb.shape[1]
    H = whh.shape[1]
    two_h = 2 * H
    dh = w1.shape[1]
    assert state_size >= two_h + n_skills, \
        "state_size must cover encoder feats + skill one-hot"

    Bp = max(_round_up(B, 8), 8)        # pad batch to full sublane tile

    # --- Pack fused-direction GRU weights (one-time parameter prep) ----------
    # Gate-column layout [r_f r_b | z_f z_b | n_f n_b]; hidden weights are
    # block-diagonal over [h_f | h_b]; input weights are block over [x(t)|x(T-1-t)].
    wih_block = jnp.zeros((2 * E, 6 * H), jnp.float32)
    whh_cat = jnp.zeros((2 * H, 6 * H), jnp.float32)
    bgx = jnp.zeros((1, 6 * H), jnp.float32)
    for g in range(3):                   # gates r, z, n
        src = slice(g * H, (g + 1) * H)
        for d in range(2):               # directions fwd, bwd
            dst = slice((2 * g + d) * H, (2 * g + d + 1) * H)
            wih_block = wih_block.at[d * E:(d + 1) * E, dst].set(wih[d][:, src])
            whh_cat = whh_cat.at[d * H:(d + 1) * H, dst].set(whh[d][:, src])
            badd = bih[d][:, src]
            if g < 2:                    # r, z: fold hidden bias into gx bias
                badd = badd + bhh[d][:, src]
            bgx = bgx.at[:, dst].set(badd)
    bhn = jnp.concatenate([bhh[0][:, 2 * H:3 * H], bhh[1][:, 2 * H:3 * H]],
                          axis=-1)                               # (1, 2H)

    # --- Embedding gather + direction pairing (XLA glue feeding one slab) ----
    # TODO(synk): no <pad> masking in the GRU / mean-pool (nmtpytorch uses
    # masked/packed sequences); the demo batch contains no pad tokens.
    x_emb = jnp.take(emb, tokens, axis=0)                        # (T, B, E)
    x_emb = jnp.pad(x_emb, ((0, 0), (0, Bp - B), (0, 0)))        # (T, Bp, E)
    x_pair = jnp.concatenate([x_emb, x_emb[::-1]], axis=-1)      # [x(t) | x(T-1-t)]
    xp = x_pair.reshape(T * Bp, 2 * E).astype(jnp.bfloat16)

    # --- Fold the synthetic DIAYN state [feats(2H) | zeros | one_hot(skill)]
    #     into the discriminator layer-1 params; pad to full-lane widths. -----
    DHP = 128                                                    # 30 -> 128 lanes
    LOGP = 128                                                   # lane-dense logits
    pad_d = DHP - dh
    pad_s = LOGP - n_skills

    w1_feat = w1[:two_h]                                         # (2H, dh)
    skill_row = w1[state_size - n_skills + skill_id]             # (dh,)
    b1_eff = b1 + skill_row[None, :]

    w1p = jnp.pad(w1_feat, ((0, 0), (0, pad_d)))
    b1p = jnp.pad(b1_eff, ((0, 0), (0, pad_d)))
    w2p = jnp.pad(w2, ((0, pad_d), (0, pad_d)))
    b2p = jnp.pad(b2, ((0, 0), (0, pad_d)))
    w3p = jnp.pad(w3, ((0, pad_d), (0, pad_s)))
    b3p = jnp.pad(b3, ((0, 0), (0, pad_s)))

    ctx_flat, logits_pad = encode_and_discriminate(
        xp, T, Bp, two_h,
        wih_block.astype(jnp.bfloat16), whh_cat.astype(jnp.bfloat16),
        bgx, bhn, w1p, b1p, w2p, b2p, w3p, b3p)

    ctx = ctx_flat.reshape(T, Bp, two_h)[:, :B]
    logits = logits_pad[:B, :n_skills]

    # TODO(synk): agent.run_n_episodes (SAC actor/critic updates, replay buffer,
    # episode loop) is external library code with no kernel-level equivalent;
    # forward() itself only returns a zero placeholder loss, reproduced here.
    loss = jnp.zeros((1,), jnp.float32)
    return {'loss': loss, 'n_items': 1, 'ctx': ctx, 'disc_logits': logits}


# --------------------------------------------------------------------------
if __name__ == "__main__":
    # Small shapes consistent with the module (emb/enc dims scaled down).
    T, B = 8, 4            # seq len, batch
    V, E, H = 32, 32, 64   # vocab, emb_dim, enc_dim  (2H = 128 lane-dense ctx)
    STATE, DISC_H, SKILLS = 840, 30, 4   # DIAYN: state_size / [30,30] / num_skills

    key = jax.random.PRNGKey(0)
    k_tok, k_par = jax.random.split(key)
    tokens = jax.random.randint(k_tok, (T, B), 1, V, dtype=jnp.int32)  # no <pad>
    emb, gru, disc = make_params(k_par, V, E, H, STATE, DISC_H, SKILLS)

    out = diayn_agent_forward(tokens, emb, gru, disc,
                              state_size=STATE, n_skills=SKILLS)
    jax.block_until_ready(out['ctx'])
    jax.block_until_ready(out['disc_logits'])
    jax.block_until_ready(out['loss'])
    assert out['ctx'].shape == (T, B, 2 * H)
    assert out['disc_logits'].shape == (B, SKILLS)
    assert out['loss'].shape == (1,)
    print("KERNEL_OK")
</pallas_src>

<mosaic_0001>
module attributes {stable_mosaic.version = 11 : i64} {
  func.func @_encoder_disc_kernel(%arg0: memref<64x64xbf16, #tpu.memory_space<vmem>>, %arg1: memref<64x384xbf16, #tpu.memory_space<vmem>>, %arg2: memref<128x384xbf16, #tpu.memory_space<vmem>>, %arg3: memref<1x384xf32, #tpu.memory_space<vmem>>, %arg4: memref<1x128xf32, #tpu.memory_space<vmem>>, %arg5: memref<128x128xf32, #tpu.memory_space<vmem>>, %arg6: memref<1x128xf32, #tpu.memory_space<vmem>>, %arg7: memref<128x128xf32, #tpu.memory_space<vmem>>, %arg8: memref<1x128xf32, #tpu.memory_space<vmem>>, %arg9: memref<128x128xf32, #tpu.memory_space<vmem>>, %arg10: memref<1x128xf32, #tpu.memory_space<vmem>>, %arg11: memref<64x128xf32, #tpu.memory_space<vmem>>, %arg12: memref<8x128xf32, #tpu.memory_space<vmem>>) attributes {dimension_semantics = [], scalar_prefetch = 0 : i64, scratch_operands = 0 : i64, tpu.core_type = #tpu.core_type<tc>} {
    %c0 = arith.constant 0 : index
    %c0_0 = arith.constant 0 : index
    %0 = vector.load %arg0[%c0, %c0_0] : memref<64x64xbf16, #tpu.memory_space<vmem>>, vector<64x64xbf16>
    %c0_1 = arith.constant 0 : index
    %c0_2 = arith.constant 0 : index
    %1 = vector.load %arg1[%c0_1, %c0_2] : memref<64x384xbf16, #tpu.memory_space<vmem>>, vector<64x384xbf16>
    %cst = arith.constant dense<0.000000e+00> : vector<64x384xf32>
    %2 = tpu.matmul %0, %1, %cst {dimension_numbers = #tpu.dot_dimension_numbers<[1], [0], [0], [1], [0, 0, 1, 1], [], []>} : vector<64x64xbf16>, vector<64x384xbf16>, vector<64x384xf32> -> vector<64x384xf32>
    %c0_3 = arith.constant 0 : index
    %c0_4 = arith.constant 0 : index
    %3 = vector.load %arg3[%c0_3, %c0_4] : memref<1x384xf32, #tpu.memory_space<vmem>>, vector<1x384xf32>
    %4 = vector.broadcast %3 : vector<1x384xf32> to vector<64x384xf32>
    %5 = arith.addf %2, %4 : vector<64x384xf32>
    %c0_5 = arith.constant 0 : index
    %c0_6 = arith.constant 0 : index
    %6 = vector.load %arg2[%c0_5, %c0_6] : memref<128x384xbf16, #tpu.memory_space<vmem>>, vector<128x384xbf16>
    %c0_7 = arith.constant 0 : index
    %c0_8 = arith.constant 0 : index
    %7 = vector.load %arg4[%c0_7, %c0_8] : memref<1x128xf32, #tpu.memory_space<vmem>>, vector<1x128xf32>
    %8 = vector.shape_cast %7 : vector<1x128xf32> to vector<1x128xf32>
    %9 = vector.broadcast %8 : vector<1x128xf32> to vector<8x128xf32>
    %cst_9 = arith.constant 0.000000e+00 : f32
    %10 = vector.broadcast %cst_9 : f32 to vector<8x128xf32>
    %11 = vector.extract_strided_slice %5 {offsets = [0, 0], sizes = [8, 384], strides = [1, 1]} : vector<64x384xf32> to vector<8x384xf32>
    %12 = arith.truncf %10 : vector<8x128xf32> to vector<8x128xbf16>
    %cst_10 = arith.constant dense<0.000000e+00> : vector<8x384xf32>
    %13 = tpu.matmul %12, %6, %cst_10 {dimension_numbers = #tpu.dot_dimension_numbers<[1], [0], [0], [1], [0, 0, 1, 1], [], []>} : vector<8x128xbf16>, vector<128x384xbf16>, vector<8x384xf32> -> vector<8x384xf32>
    %14 = vector.extract_strided_slice %11 {offsets = [0, 0], sizes = [8, 128], strides = [1, 1]} : vector<8x384xf32> to vector<8x128xf32>
    %15 = vector.extract_strided_slice %13 {offsets = [0, 0], sizes = [8, 128], strides = [1, 1]} : vector<8x384xf32> to vector<8x128xf32>
    %16 = arith.addf %14, %15 : vector<8x128xf32>
    %17 = arith.negf %16 : vector<8x128xf32>
    %18 = math.exp %17 : vector<8x128xf32>
    %cst_11 = arith.constant 1.000000e+00 : f32
    %19 = vector.broadcast %cst_11 : f32 to vector<8x128xf32>
    %20 = arith.addf %19, %18 : vector<8x128xf32>
    %21 = arith.divf %19, %20 : vector<8x128xf32>
    %22 = vector.extract_strided_slice %11 {offsets = [0, 128], sizes = [8, 128], strides = [1, 1]} : vector<8x384xf32> to vector<8x128xf32>
    %23 = vector.extract_strided_slice %13 {offsets = [0, 128], sizes = [8, 128], strides = [1, 1]} : vector<8x384xf32> to vector<8x128xf32>
    %24 = arith.addf %22, %23 : vector<8x128xf32>
    %25 = arith.negf %24 : vector<8x128xf32>
    %26 = math.exp %25 : vector<8x128xf32>
    %cst_12 = arith.constant 1.000000e+00 : f32
    %27 = vector.broadcast %cst_12 : f32 to vector<8x128xf32>
    %28 = arith.addf %27, %26 : vector<8x128xf32>
    %29 = arith.divf %27, %28 : vector<8x128xf32>
    %30 = vector.extract_strided_slice %11 {offsets = [0, 256], sizes = [8, 128], strides = [1, 1]} : vector<8x384xf32> to vector<8x128xf32>
    %31 = vector.extract_strided_slice %13 {offsets = [0, 256], sizes = [8, 128], strides = [1, 1]} : vector<8x384xf32> to vector<8x128xf32>
    %32 = arith.addf %31, %9 : vector<8x128xf32>
    %33 = arith.mulf %21, %32 : vector<8x128xf32>
    %34 = arith.addf %30, %33 : vector<8x128xf32>
    %35 = math.tanh %34 : vector<8x128xf32>
    %cst_13 = arith.constant 1.000000e+00 : f32
    %36 = vector.broadcast %cst_13 : f32 to vector<8x128xf32>
    %37 = arith.subf %36, %29 : vector<8x128xf32>
    %38 = arith.mulf %37, %35 : vector<8x128xf32>
    %39 = arith.mulf %29, %10 : vector<8x128xf32>
    %40 = arith.addf %38, %39 : vector<8x128xf32>
    %41 = vector.extract_strided_slice %5 {offsets = [8, 0], sizes = [8, 384], strides = [1, 1]} : vector<64x384xf32> to vector<8x384xf32>
    %42 = arith.truncf %40 : vector<8x128xf32> to vector<8x128xbf16>
    %cst_14 = arith.constant dense<0.000000e+00> : vector<8x384xf32>
    %43 = tpu.matmul %42, %6, %cst_14 {dimension_numbers = #tpu.dot_dimension_numbers<[1], [0], [0], [1], [0, 0, 1, 1], [], []>} : vector<8x128xbf16>, vector<128x384xbf16>, vector<8x384xf32> -> vector<8x384xf32>
    %44 = vector.extract_strided_slice %41 {offsets = [0, 0], sizes = [8, 128], strides = [1, 1]} : vector<8x384xf32> to vector<8x128xf32>
    %45 = vector.extract_strided_slice %43 {offsets = [0, 0], sizes = [8, 128], strides = [1, 1]} : vector<8x384xf32> to vector<8x128xf32>
    %46 = arith.addf %44, %45 : vector<8x128xf32>
    %47 = arith.negf %46 : vector<8x128xf32>
    %48 = math.exp %47 : vector<8x128xf32>
    %cst_15 = arith.constant 1.000000e+00 : f32
    %49 = vector.broadcast %cst_15 : f32 to vector<8x128xf32>
    %50 = arith.addf %49, %48 : vector<8x128xf32>
    %51 = arith.divf %49, %50 : vector<8x128xf32>
    %52 = vector.extract_strided_slice %41 {offsets = [0, 128], sizes = [8, 128], strides = [1, 1]} : vector<8x384xf32> to vector<8x128xf32>
    %53 = vector.extract_strided_slice %43 {offsets = [0, 128], sizes = [8, 128], strides = [1, 1]} : vector<8x384xf32> to vector<8x128xf32>
    %54 = arith.addf %52, %53 : vector<8x128xf32>
    %55 = arith.negf %54 : vector<8x128xf32>
    %56 = math.exp %55 : vector<8x128xf32>
    %cst_16 = arith.constant 1.000000e+00 : f32
    %57 = vector.broadcast %cst_16 : f32 to vector<8x128xf32>
    %58 = arith.addf %57, %56 : vector<8x128xf32>
    %59 = arith.divf %57, %58 : vector<8x128xf32>
    %60 = vector.extract_strided_slice %41 {offsets = [0, 256], sizes = [8, 128], strides = [1, 1]} : vector<8x384xf32> to vector<8x128xf32>
    %61 = vector.extract_strided_slice %43 {offsets = [0, 256], sizes = [8, 128], strides = [1, 1]} : vector<8x384xf32> to vector<8x128xf32>
    %62 = arith.addf %61, %9 : vector<8x128xf32>
    %63 = arith.mulf %51, %62 : vector<8x128xf32>
    %64 = arith.addf %60, %63 : vector<8x128xf32>
    %65 = math.tanh %64 : vector<8x128xf32>
    %cst_17 = arith.constant 1.000000e+00 : f32
    %66 = vector.broadcast %cst_17 : f32 to vector<8x128xf32>
    %67 = arith.subf %66, %59 : vector<8x128xf32>
    %68 = arith.mulf %67, %65 : vector<8x128xf32>
    %69 = arith.mulf %59, %40 : vector<8x128xf32>
    %70 = arith.addf %68, %69 : vector<8x128xf32>
    %71 = vector.extract_strided_slice %5 {offsets = [16, 0], sizes = [8, 384], strides = [1, 1]} : vector<64x384xf32> to vector<8x384xf32>
    %72 = arith.truncf %70 : vector<8x128xf32> to vector<8x128xbf16>
    %cst_18 = arith.constant dense<0.000000e+00> : vector<8x384xf32>
    %73 = tpu.matmul %72, %6, %cst_18 {dimension_numbers = #tpu.dot_dimension_numbers<[1], [0], [0], [1], [0, 0, 1, 1], [], []>} : vector<8x128xbf16>, vector<128x384xbf16>, vector<8x384xf32> -> vector<8x384xf32>
    %74 = vector.extract_strided_slice %71 {offsets = [0, 0], sizes = [8, 128], strides = [1, 1]} : vector<8x384xf32> to vector<8x128xf32>
    %75 = vector.extract_strided_slice %73 {offsets = [0, 0], sizes = [8, 128], strides = [1, 1]} : vector<8x384xf32> to vector<8x128xf32>
    %76 = arith.addf %74, %75 : vector<8x128xf32>
    %77 = arith.negf %76 : vector<8x128xf32>
    %78 = math.exp %77 : vector<8x128xf32>
    %cst_19 = arith.constant 1.000000e+00 : f32
    %79 = vector.broadcast %cst_19 : f32 to vector<8x128xf32>
    %80 = arith.addf %79, %78 : vector<8x128xf32>
    %81 = arith.divf %79, %80 : vector<8x128xf32>
    %82 = vector.extract_strided_slice %71 {offsets = [0, 128], sizes = [8, 128], strides = [1, 1]} : vector<8x384xf32> to vector<8x128xf32>
    %83 = vector.extract_strided_slice %73 {offsets = [0, 128], sizes = [8, 128], strides = [1, 1]} : vector<8x384xf32> to vector<8x128xf32>
    %84 = arith.addf %82, %83 : vector<8x128xf32>
    %85 = arith.negf %84 : vector<8x128xf32>
    %86 = math.exp %85 : vector<8x128xf32>
    %cst_20 = arith.constant 1.000000e+00 : f32
    %87 = vector.broadcast %cst_20 : f32 to vector<8x128xf32>
    %88 = arith.addf %87, %86 : vector<8x128xf32>
    %89 = arith.divf %87, %88 : vector<8x128xf32>
    %90 = vector.extract_strided_slice %71 {offsets = [0, 256], sizes = [8, 128], strides = [1, 1]} : vector<8x384xf32> to vector<8x128xf32>
    %91 = vector.extract_strided_slice %73 {offsets = [0, 256], sizes = [8, 128], strides = [1, 1]} : vector<8x384xf32> to vector<8x128xf32>
    %92 = arith.addf %91, %9 : vector<8x128xf32>
    %93 = arith.mulf %81, %92 : vector<8x128xf32>
    %94 = arith.addf %90, %93 : vector<8x128xf32>
    %95 = math.tanh %94 : vector<8x128xf32>
    %cst_21 = arith.constant 1.000000e+00 : f32
    %96 = vector.broadcast %cst_21 : f32 to vector<8x128xf32>
    %97 = arith.subf %96, %89 : vector<8x128xf32>
    %98 = arith.mulf %97, %95 : vector<8x128xf32>
    %99 = arith.mulf %89, %70 : vector<8x128xf32>
    %100 = arith.addf %98, %99 : vector<8x128xf32>
    %101 = vector.extract_strided_slice %5 {offsets = [24, 0], sizes = [8, 384], strides = [1, 1]} : vector<64x384xf32> to vector<8x384xf32>
    %102 = arith.truncf %100 : vector<8x128xf32> to vector<8x128xbf16>
    %cst_22 = arith.constant dense<0.000000e+00> : vector<8x384xf32>
    %103 = tpu.matmul %102, %6, %cst_22 {dimension_numbers = #tpu.dot_dimension_numbers<[1], [0], [0], [1], [0, 0, 1, 1], [], []>} : vector<8x128xbf16>, vector<128x384xbf16>, vector<8x384xf32> -> vector<8x384xf32>
    %104 = vector.extract_strided_slice %101 {offsets = [0, 0], sizes = [8, 128], strides = [1, 1]} : vector<8x384xf32> to vector<8x128xf32>
    %105 = vector.extract_strided_slice %103 {offsets = [0, 0], sizes = [8, 128], strides = [1, 1]} : vector<8x384xf32> to vector<8x128xf32>
    %106 = arith.addf %104, %105 : vector<8x128xf32>
    %107 = arith.negf %106 : vector<8x128xf32>
    %108 = math.exp %107 : vector<8x128xf32>
    %cst_23 = arith.constant 1.000000e+00 : f32
    %109 = vector.broadcast %cst_23 : f32 to vector<8x128xf32>
    %110 = arith.addf %109, %108 : vector<8x128xf32>
    %111 = arith.divf %109, %110 : vector<8x128xf32>
    %112 = vector.extract_strided_slice %101 {offsets = [0, 128], sizes = [8, 128], strides = [1, 1]} : vector<8x384xf32> to vector<8x128xf32>
    %113 = vector.extract_strided_slice %103 {offsets = [0, 128], sizes = [8, 128], strides = [1, 1]} : vector<8x384xf32> to vector<8x128xf32>
    %114 = arith.addf %112, %113 : vector<8x128xf32>
    %115 = arith.negf %114 : vector<8x128xf32>
    %116 = math.exp %115 : vector<8x128xf32>
    %cst_24 = arith.constant 1.000000e+00 : f32
    %117 = vector.broadcast %cst_24 : f32 to vector<8x128xf32>
    %118 = arith.addf %117, %116 : vector<8x128xf32>
    %119 = arith.divf %117, %118 : vector<8x128xf32>
    %120 = vector.extract_strided_slice %101 {offsets = [0, 256], sizes = [8, 128], strides = [1, 1]} : vector<8x384xf32> to vector<8x128xf32>
    %121 = vector.extract_strided_slice %103 {offsets = [0, 256], sizes = [8, 128], strides = [1, 1]} : vector<8x384xf32> to vector<8x128xf32>
    %122 = arith.addf %121, %9 : vector<8x128xf32>
    %123 = arith.mulf %111, %122 : vector<8x128xf32>
    %124 = arith.addf %120, %123 : vector<8x128xf32>
    %125 = math.tanh %124 : vector<8x128xf32>
    %cst_25 = arith.constant 1.000000e+00 : f32
    %126 = vector.broadcast %cst_25 : f32 to vector<8x128xf32>
    %127 = arith.subf %126, %119 : vector<8x128xf32>
    %128 = arith.mulf %127, %125 : vector<8x128xf32>
    %129 = arith.mulf %119, %100 : vector<8x128xf32>
    %130 = arith.addf %128, %129 : vector<8x128xf32>
    %131 = vector.extract_strided_slice %5 {offsets = [32, 0], sizes = [8, 384], strides = [1, 1]} : vector<64x384xf32> to vector<8x384xf32>
    %132 = arith.truncf %130 : vector<8x128xf32> to vector<8x128xbf16>
    %cst_26 = arith.constant dense<0.000000e+00> : vector<8x384xf32>
    %133 = tpu.matmul %132, %6, %cst_26 {dimension_numbers = #tpu.dot_dimension_numbers<[1], [0], [0], [1], [0, 0, 1, 1], [], []>} : vector<8x128xbf16>, vector<128x384xbf16>, vector<8x384xf32> -> vector<8x384xf32>
    %134 = vector.extract_strided_slice %131 {offsets = [0, 0], sizes = [8, 128], strides = [1, 1]} : vector<8x384xf32> to vector<8x128xf32>
    %135 = vector.extract_strided_slice %133 {offsets = [0, 0], sizes = [8, 128], strides = [1, 1]} : vector<8x384xf32> to vector<8x128xf32>
    %136 = arith.addf %134, %135 : vector<8x128xf32>
    %137 = arith.negf %136 : vector<8x128xf32>
    %138 = math.exp %137 : vector<8x128xf32>
    %cst_27 = arith.constant 1.000000e+00 : f32
    %139 = vector.broadcast %cst_27 : f32 to vector<8x128xf32>
    %140 = arith.addf %139, %138 : vector<8x128xf32>
    %141 = arith.divf %139, %140 : vector<8x128xf32>
    %142 = vector.extract_strided_slice %131 {offsets = [0, 128], sizes = [8, 128], strides = [1, 1]} : vector<8x384xf32> to vector<8x128xf32>
    %143 = vector.extract_strided_slice %133 {offsets = [0, 128], sizes = [8, 128], strides = [1, 1]} : vector<8x384xf32> to vector<8x128xf32>
    %144 = arith.addf %142, %143 : vector<8x128xf32>
    %145 = arith.negf %144 : vector<8x128xf32>
    %146 = math.exp %145 : vector<8x128xf32>
    %cst_28 = arith.constant 1.000000e+00 : f32
    %147 = vector.broadcast %cst_28 : f32 to vector<8x128xf32>
    %148 = arith.addf %147, %146 : vector<8x128xf32>
    %149 = arith.divf %147, %148 : vector<8x128xf32>
    %150 = vector.extract_strided_slice %131 {offsets = [0, 256], sizes = [8, 128], strides = [1, 1]} : vector<8x384xf32> to vector<8x128xf32>
    %151 = vector.extract_strided_slice %133 {offsets = [0, 256], sizes = [8, 128], strides = [1, 1]} : vector<8x384xf32> to vector<8x128xf32>
    %152 = arith.addf %151, %9 : vector<8x128xf32>
    %153 = arith.mulf %141, %152 : vector<8x128xf32>
    %154 = arith.addf %150, %153 : vector<8x128xf32>
    %155 = math.tanh %154 : vector<8x128xf32>
    %cst_29 = arith.constant 1.000000e+00 : f32
    %156 = vector.broadcast %cst_29 : f32 to vector<8x128xf32>
    %157 = arith.subf %156, %149 : vector<8x128xf32>
    %158 = arith.mulf %157, %155 : vector<8x128xf32>
    %159 = arith.mulf %149, %130 : vector<8x128xf32>
    %160 = arith.addf %158, %159 : vector<8x128xf32>
    %161 = vector.extract_strided_slice %5 {offsets = [40, 0], sizes = [8, 384], strides = [1, 1]} : vector<64x384xf32> to vector<8x384xf32>
    %162 = arith.truncf %160 : vector<8x128xf32> to vector<8x128xbf16>
    %cst_30 = arith.constant dense<0.000000e+00> : vector<8x384xf32>
    %163 = tpu.matmul %162, %6, %cst_30 {dimension_numbers = #tpu.dot_dimension_numbers<[1], [0], [0], [1], [0, 0, 1, 1], [], []>} : vector<8x128xbf16>, vector<128x384xbf16>, vector<8x384xf32> -> vector<8x384xf32>
    %164 = vector.extract_strided_slice %161 {offsets = [0, 0], sizes = [8, 128], strides = [1, 1]} : vector<8x384xf32> to vector<8x128xf32>
    %165 = vector.extract_strided_slice %163 {offsets = [0, 0], sizes = [8, 128], strides = [1, 1]} : vector<8x384xf32> to vector<8x128xf32>
    %166 = arith.addf %164, %165 : vector<8x128xf32>
    %167 = arith.negf %166 : vector<8x128xf32>
    %168 = math.exp %167 : vector<8x128xf32>
    %cst_31 = arith.constant 1.000000e+00 : f32
    %169 = vector.broadcast %cst_31 : f32 to vector<8x128xf32>
    %170 = arith.addf %169, %168 : vector<8x128xf32>
    %171 = arith.divf %169, %170 : vector<8x128xf32>
    %172 = vector.extract_strided_slice %161 {offsets = [0, 128], sizes = [8, 128], strides = [1, 1]} : vector<8x384xf32> to vector<8x128xf32>
    %173 = vector.extract_strided_slice %163 {offsets = [0, 128], sizes = [8, 128], strides = [1, 1]} : vector<8x384xf32> to vector<8x128xf32>
    %174 = arith.addf %172, %173 : vector<8x128xf32>
    %175 = arith.negf %174 : vector<8x128xf32>
    %176 = math.exp %175 : vector<8x128xf32>
    %cst_32 = arith.constant 1.000000e+00 : f32
    %177 = vector.broadcast %cst_32 : f32 to vector<8x128xf32>
    %178 = arith.addf %177, %176 : vector<8x128xf32>
    %179 = arith.divf %177, %178 : vector<8x128xf32>
    %180 = vector.extract_strided_slice %161 {offsets = [0, 256], sizes = [8, 128], strides = [1, 1]} : vector<8x384xf32> to vector<8x128xf32>
    %181 = vector.extract_strided_slice %163 {offsets = [0, 256], sizes = [8, 128], strides = [1, 1]} : vector<8x384xf32> to vector<8x128xf32>
    %182 = arith.addf %181, %9 : vector<8x128xf32>
    %183 = arith.mulf %171, %182 : vector<8x128xf32>
    %184 = arith.addf %180, %183 : vector<8x128xf32>
    %185 = math.tanh %184 : vector<8x128xf32>
    %cst_33 = arith.constant 1.000000e+00 : f32
    %186 = vector.broadcast %cst_33 : f32 to vector<8x128xf32>
    %187 = arith.subf %186, %179 : vector<8x128xf32>
    %188 = arith.mulf %187, %185 : vector<8x128xf32>
    %189 = arith.mulf %179, %160 : vector<8x128xf32>
    %190 = arith.addf %188, %189 : vector<8x128xf32>
    %191 = vector.extract_strided_slice %5 {offsets = [48, 0], sizes = [8, 384], strides = [1, 1]} : vector<64x384xf32> to vector<8x384xf32>
    %192 = arith.truncf %190 : vector<8x128xf32> to vector<8x128xbf16>
    %cst_34 = arith.constant dense<0.000000e+00> : vector<8x384xf32>
    %193 = tpu.matmul %192, %6, %cst_34 {dimension_numbers = #tpu.dot_dimension_numbers<[1], [0], [0], [1], [0, 0, 1, 1], [], []>} : vector<8x128xbf16>, vector<128x384xbf16>, vector<8x384xf32> -> vector<8x384xf32>
    %194 = vector.extract_strided_slice %191 {offsets = [0, 0], sizes = [8, 128], strides = [1, 1]} : vector<8x384xf32> to vector<8x128xf32>
    %195 = vector.extract_strided_slice %193 {offsets = [0, 0], sizes = [8, 128], strides = [1, 1]} : vector<8x384xf32> to vector<8x128xf32>
    %196 = arith.addf %194, %195 : vector<8x128xf32>
    %197 = arith.negf %196 : vector<8x128xf32>
    %198 = math.exp %197 : vector<8x128xf32>
    %cst_35 = arith.constant 1.000000e+00 : f32
    %199 = vector.broadcast %cst_35 : f32 to vector<8x128xf32>
    %200 = arith.addf %199, %198 : vector<8x128xf32>
    %201 = arith.divf %199, %200 : vector<8x128xf32>
    %202 = vector.extract_strided_slice %191 {offsets = [0, 128], sizes = [8, 128], strides = [1, 1]} : vector<8x384xf32> to vector<8x128xf32>
    %203 = vector.extract_strided_slice %193 {offsets = [0, 128], sizes = [8, 128], strides = [1, 1]} : vector<8x384xf32> to vector<8x128xf32>
    %204 = arith.addf %202, %203 : vector<8x128xf32>
    %205 = arith.negf %204 : vector<8x128xf32>
    %206 = math.exp %205 : vector<8x128xf32>
    %cst_36 = arith.constant 1.000000e+00 : f32
    %207 = vector.broadcast %cst_36 : f32 to vector<8x128xf32>
    %208 = arith.addf %207, %206 : vector<8x128xf32>
    %209 = arith.divf %207, %208 : vector<8x128xf32>
    %210 = vector.extract_strided_slice %191 {offsets = [0, 256], sizes = [8, 128], strides = [1, 1]} : vector<8x384xf32> to vector<8x128xf32>
    %211 = vector.extract_strided_slice %193 {offsets = [0, 256], sizes = [8, 128], strides = [1, 1]} : vector<8x384xf32> to vector<8x128xf32>
    %212 = arith.addf %211, %9 : vector<8x128xf32>
    %213 = arith.mulf %201, %212 : vector<8x128xf32>
    %214 = arith.addf %210, %213 : vector<8x128xf32>
    %215 = math.tanh %214 : vector<8x128xf32>
    %cst_37 = arith.constant 1.000000e+00 : f32
    %216 = vector.broadcast %cst_37 : f32 to vector<8x128xf32>
    %217 = arith.subf %216, %209 : vector<8x128xf32>
    %218 = arith.mulf %217, %215 : vector<8x128xf32>
    %219 = arith.mulf %209, %190 : vector<8x128xf32>
    %220 = arith.addf %218, %219 : vector<8x128xf32>
    %221 = vector.extract_strided_slice %5 {offsets = [56, 0], sizes = [8, 384], strides = [1, 1]} : vector<64x384xf32> to vector<8x384xf32>
    %222 = arith.truncf %220 : vector<8x128xf32> to vector<8x128xbf16>
    %cst_38 = arith.constant dense<0.000000e+00> : vector<8x384xf32>
    %223 = tpu.matmul %222, %6, %cst_38 {dimension_numbers = #tpu.dot_dimension_numbers<[1], [0], [0], [1], [0, 0, 1, 1], [], []>} : vector<8x128xbf16>, vector<128x384xbf16>, vector<8x384xf32> -> vector<8x384xf32>
    %224 = vector.extract_strided_slice %221 {offsets = [0, 0], sizes = [8, 128], strides = [1, 1]} : vector<8x384xf32> to vector<8x128xf32>
    %225 = vector.extract_strided_slice %223 {offsets = [0, 0], sizes = [8, 128], strides = [1, 1]} : vector<8x384xf32> to vector<8x128xf32>
    %226 = arith.addf %224, %225 : vector<8x128xf32>
    %227 = arith.negf %226 : vector<8x128xf32>
    %228 = math.exp %227 : vector<8x128xf32>
    %cst_39 = arith.constant 1.000000e+00 : f32
    %229 = vector.broadcast %cst_39 : f32 to vector<8x128xf32>
    %230 = arith.addf %229, %228 : vector<8x128xf32>
    %231 = arith.divf %229, %230 : vector<8x128xf32>
    %232 = vector.extract_strided_slice %221 {offsets = [0, 128], sizes = [8, 128], strides = [1, 1]} : vector<8x384xf32> to vector<8x128xf32>
    %233 = vector.extract_strided_slice %223 {offsets = [0, 128], sizes = [8, 128], strides = [1, 1]} : vector<8x384xf32> to vector<8x128xf32>
    %234 = arith.addf %232, %233 : vector<8x128xf32>
    %235 = arith.negf %234 : vector<8x128xf32>
    %236 = math.exp %235 : vector<8x128xf32>
    %cst_40 = arith.constant 1.000000e+00 : f32
    %237 = vector.broadcast %cst_40 : f32 to vector<8x128xf32>
    %238 = arith.addf %237, %236 : vector<8x128xf32>
    %239 = arith.divf %237, %238 : vector<8x128xf32>
    %240 = vector.extract_strided_slice %221 {offsets = [0, 256], sizes = [8, 128], strides = [1, 1]} : vector<8x384xf32> to vector<8x128xf32>
    %241 = vector.extract_strided_slice %223 {offsets = [0, 256], sizes = [8, 128], strides = [1, 1]} : vector<8x384xf32> to vector<8x128xf32>
    %242 = arith.addf %241, %9 : vector<8x128xf32>
    %243 = arith.mulf %231, %242 : vector<8x128xf32>
    %244 = arith.addf %240, %243 : vector<8x128xf32>
    %245 = math.tanh %244 : vector<8x128xf32>
    %cst_41 = arith.constant 1.000000e+00 : f32
    %246 = vector.broadcast %cst_41 : f32 to vector<8x128xf32>
    %247 = arith.subf %246, %239 : vector<8x128xf32>
    %248 = arith.mulf %247, %245 : vector<8x128xf32>
    %249 = arith.mulf %239, %220 : vector<8x128xf32>
    %250 = arith.addf %248, %249 : vector<8x128xf32>
    %251 = tpu.iota {dimensions = array<i32: 1>} : vector<8x128xi32>
    %c64_i32 = arith.constant 64 : i32
    %252 = vector.broadcast %c64_i32 : i32 to vector<8x128xi32>
    %253 = arith.cmpi slt, %251, %252 : vector<8x128xi32>
    %254 = arith.select %253, %40, %250 : vector<8x128xi1>, vector<8x128xf32>
    %255 = arith.select %253, %70, %220 : vector<8x128xi1>, vector<8x128xf32>
    %256 = arith.select %253, %100, %190 : vector<8x128xi1>, vector<8x128xf32>
    %257 = arith.select %253, %130, %160 : vector<8x128xi1>, vector<8x128xf32>
    %258 = arith.select %253, %160, %130 : vector<8x128xi1>, vector<8x128xf32>
    %259 = arith.select %253, %190, %100 : vector<8x128xi1>, vector<8x128xf32>
    %260 = arith.select %253, %220, %70 : vector<8x128xi1>, vector<8x128xf32>
    %261 = arith.select %253, %250, %40 : vector<8x128xi1>, vector<8x128xf32>
    %262 = tpu.concatenate %254, %255, %256, %257, %258, %259, %260, %261 in 0 : vector<8x128xf32>, vector<8x128xf32>, vector<8x128xf32>, vector<8x128xf32>, vector<8x128xf32>, vector<8x128xf32>, vector<8x128xf32>, vector<8x128xf32> -> vector<64x128xf32>
    %c0_42 = arith.constant 0 : index
    %c0_43 = arith.constant 0 : index
    %263 = vector.load %arg11[%c0_42, %c0_43] : memref<64x128xf32, #tpu.memory_space<vmem>>, vector<64x128xf32>
    tpu.vector_store %arg11[%c0_42, %c0_43], %262 {strides = array<i32>} : memref<64x128xf32, #tpu.memory_space<vmem>>, vector<64x128xf32>,
    %264 = arith.addf %40, %70 : vector<8x128xf32>
    %265 = arith.addf %264, %100 : vector<8x128xf32>
    %266 = arith.addf %265, %130 : vector<8x128xf32>
    %267 = arith.addf %266, %160 : vector<8x128xf32>
    %268 = arith.addf %267, %190 : vector<8x128xf32>
    %269 = arith.addf %268, %220 : vector<8x128xf32>
    %270 = arith.addf %269, %250 : vector<8x128xf32>
    %cst_44 = arith.constant 1.250000e-01 : f32
    %271 = vector.broadcast %cst_44 : f32 to vector<8x128xf32>
    %272 = arith.mulf %270, %271 : vector<8x128xf32>
    %c0_45 = arith.constant 0 : index
    %c0_46 = arith.constant 0 : index
    %273 = vector.load %arg5[%c0_45, %c0_46] : memref<128x128xf32, #tpu.memory_space<vmem>>, vector<128x128xf32>
    %cst_47 = arith.constant dense<0.000000e+00> : vector<8x128xf32>
    %274 = tpu.matmul %272, %273, %cst_47 {dimension_numbers = #tpu.dot_dimension_numbers<[1], [0], [0], [1], [0, 0, 1, 1], [], []>} : vector<8x128xf32>, vector<128x128xf32>, vector<8x128xf32> -> vector<8x128xf32>
    %c0_48 = arith.constant 0 : index
    %c0_49 = arith.constant 0 : index
    %275 = vector.load %arg6[%c0_48, %c0_49] : memref<1x128xf32, #tpu.memory_space<vmem>>, vector<1x128xf32>
    %276 = vector.broadcast %275 : vector<1x128xf32> to vector<8x128xf32>
    %277 = arith.addf %274, %276 : vector<8x128xf32>
    %cst_50 = arith.constant 0.000000e+00 : f32
    %278 = vector.broadcast %cst_50 : f32 to vector<8x128xf32>
    %279 = arith.maximumf %277, %278 : vector<8x128xf32>
    %c0_51 = arith.constant 0 : index
    %c0_52 = arith.constant 0 : index
    %280 = vector.load %arg7[%c0_51, %c0_52] : memref<128x128xf32, #tpu.memory_space<vmem>>, vector<128x128xf32>
    %cst_53 = arith.constant dense<0.000000e+00> : vector<8x128xf32>
    %281 = tpu.matmul %279, %280, %cst_53 {dimension_numbers = #tpu.dot_dimension_numbers<[1], [0], [0], [1], [0, 0, 1, 1], [], []>} : vector<8x128xf32>, vector<128x128xf32>, vector<8x128xf32> -> vector<8x128xf32>
    %c0_54 = arith.constant 0 : index
    %c0_55 = arith.constant 0 : index
    %282 = vector.load %arg8[%c0_54, %c0_55] : memref<1x128xf32, #tpu.memory_space<vmem>>, vector<1x128xf32>
    %283 = vector.broadcast %282 : vector<1x128xf32> to vector<8x128xf32>
    %284 = arith.addf %281, %283 : vector<8x128xf32>
    %cst_56 = arith.constant 0.000000e+00 : f32
    %285 = vector.broadcast %cst_56 : f32 to vector<8x128xf32>
    %286 = arith.maximumf %284, %285 : vector<8x128xf32>
    %c0_57 = arith.constant 0 : index
    %c0_58 = arith.constant 0 : index
    %287 = vector.load %arg9[%c0_57, %c0_58] : memref<128x128xf32, #tpu.memory_space<vmem>>, vector<128x128xf32>
    %cst_59 = arith.constant dense<0.000000e+00> : vector<8x128xf32>
    %288 = tpu.matmul %286, %287, %cst_59 {dimension_numbers = #tpu.dot_dimension_numbers<[1], [0], [0], [1], [0, 0, 1, 1], [], []>} : vector<8x128xf32>, vector<128x128xf32>, vector<8x128xf32> -> vector<8x128xf32>
    %c0_60 = arith.constant 0 : index
    %c0_61 = arith.constant 0 : index
    %289 = vector.load %arg10[%c0_60, %c0_61] : memref<1x128xf32, #tpu.memory_space<vmem>>, vector<1x128xf32>
    %290 = vector.broadcast %289 : vector<1x128xf32> to vector<8x128xf32>
    %291 = arith.addf %288, %290 : vector<8x128xf32>
    %c0_62 = arith.constant 0 : index
    %c0_63 = arith.constant 0 : index
    %292 = vector.load %arg12[%c0_62, %c0_63] : memref<8x128xf32, #tpu.memory_space<vmem>>, vector<8x128xf32>
    tpu.vector_store %arg12[%c0_62, %c0_63], %291 {strides = array<i32>} : memref<8x128xf32, #tpu.memory_space<vmem>>, vector<8x128xf32>,
    return
  }
}

</mosaic_0001>

<bundles_post_ra>
// kernel: tpu_custom_call.1
= control target key start
LH: loop header
LB: loop body
LE: loop exit
PB: predicated region body
PF: predicated region fallthrough
CT: control target
= control target key end

     0   :  { %18 = vsyncpa [#allocation3], 0  ;;  %s3237_s0 = inlined_call_operand.hbm [shape: bf16[64,64], index: 0, kind: input, shape index: {}]   ;;  %s3238_s1 = inlined_call_operand.hbm [shape: bf16[64,384], index: 1, kind: input, shape index: {}]   ;;  %s3239_s2 = inlined_call_operand.hbm [shape: bf16[128,384], index: 2, kind: input, shape index: {}]   ;;  %s3240_s3 = inlined_call_operand.vmem [shape: f32[1,384], index: 3, kind: input, shape index: {}]   ;;  %s3241_s4 = inlined_call_operand.vmem [shape: f32[1,128], index: 4, kind: input, shape index: {}]   ;;  %s3242_s5 = inlined_call_operand.hbm [shape: f32[128,128], index: 5, kind: input, shape index: {}]   ;;  %s3243_s6 = inlined_call_operand.vmem [shape: f32[1,128], index: 6, kind: input, shape index: {}]   ;;  %s3244_s7 = inlined_call_operand.hbm [shape: f32[128,128], index: 7, kind: input, shape index: {}]   ;;  %s3245_s8 = inlined_call_operand.vmem [shape: f32[1,128], index: 8, kind: input, shape index: {}]   ;;  %s3246_s9 = inlined_call_operand.hbm [shape: f32[128,128], index: 9, kind: input, shape index: {}]   ;;  %s3247_s10 = inlined_call_operand.vmem [shape: f32[1,128], index: 10, kind: input, shape index: {}]   ;;  %s3248_s11 = inlined_call_operand.hbm [shape: f32[64,128], index: 11, kind: output, shape index: {0}]   ;;  %s3249_s12 = inlined_call_operand.hbm [shape: f32[8,128], index: 12, kind: output, shape index: {1}]  }
   0x1   :  { %19 = vsyncpa [#allocation6], 0 }
   0x2   :  { %20 = vsyncpa [#allocation9], 0 }
   0x3   :  { %21 = vsyncpa [#allocation12], 0 }
   0x4   :  { %22 = vsyncpa [#allocation4], 0 }
   0x5   :  { %23 = vsyncpa [#allocation15], 0  ;;  %s2566_s21 = smov [#allocation5]  }
   0x6   :  { %s41_s22 = sshll.u32 %s2566_s21, 4  ;;  %s42_s22 = int_to_ptr.vmem [resolvable:$true] %s41_s22 }
   0x7   :  { %s2402_s23 = scalar_lea.vmem %s42_s22, 1536  ;;  %p2407_p1 = scmp.lt.s32.totalorder %s42_s22, %s42_s22 }
   0x8   :  { %p2403_p0 = scmp.ne.s32.totalorder %s42_s22, %s2402_s23  ;;  %p2408_p2 = scmp.lt.s32.totalorder %s2402_s23, %s2402_s23 }
   0xa   :  { %p2409_p3 = por %p2408_p2, %p2407_p1 }
   0xc   :  { %p2410_p4 = pnand %p2409_p3, %p2403_p0 }
   0xe   :  { %2413 = shalt.err (!%p2410_p4)
}
   0xf   :  { %s2567_s24 = smov 192   ;;  %s2568_s25 = smov 12  }
  0x10   :  { %47 = dma.hbm_to_vmem [thread:$0]  %s3238_s1, 1536, %s42_s22, [#allocation6], %s2567_s24, %s2567_s24, %s2568_s25  }
  0x11   :  { %s2569_s28 = smov [#allocation8]  }
  0x12   :  { %s69_s29 = sshll.u32 %s2569_s28, 4  ;;  %s70_s29 = int_to_ptr.vmem [resolvable:$true] %s69_s29 }
  0x13   :  { %s2422_s30 = scalar_lea.vmem %s70_s29, 2048  ;;  %p2427_p6 = scmp.lt.s32.totalorder %s70_s29, %s70_s29 }
  0x14   :  { %p2423_p5 = scmp.ne.s32.totalorder %s70_s29, %s2422_s30  ;;  %p2428_p7 = scmp.lt.s32.totalorder %s2422_s30, %s2422_s30 }
  0x16   :  { %p2429_p8 = por %p2428_p7, %p2427_p6 }
  0x18   :  { %p2430_p9 = pnand %p2429_p8, %p2423_p5 }
  0x1a   :  { %2433 = shalt.err (!%p2430_p9)
}
  0x1b   :  { %s2570_s13 = smov 128   ;;  %s2571_s14 = smov 8  }
  0x1c   :  { %75 = dma.hbm_to_vmem [thread:$0]  %s3242_s5, 2048, %s70_s29, [#allocation9], %s2570_s13, %s2570_s13, %s2571_s14  }
  0x1d   :  { %s2572_s1 = smov [#allocation2]  }
  0x1e   :  { %s29_s17 = sshll.u32 %s2572_s1, 4  ;;  %s30_s17 = int_to_ptr.vmem [resolvable:$true] %s29_s17 }
  0x1f   :  { %s2442_s18 = scalar_lea.vmem %s30_s17, 512  ;;  %p2447_p11 = scmp.lt.s32.totalorder %s30_s17, %s30_s17 }
  0x20   :  { %p2443_p10 = scmp.ne.s32.totalorder %s30_s17, %s2442_s18  ;;  %p2448_p12 = scmp.lt.s32.totalorder %s2442_s18, %s2442_s18 }
  0x22   :  { %p2449_p13 = por %p2448_p12, %p2447_p11 }
  0x24   :  { %p2450_p0 = pnand %p2449_p13, %p2443_p10 }
  0x26   :  { %2453 = shalt.err (!%p2450_p0)
}
  0x27   :  { %s2573_s19 = smov 64   ;;  %s2574_s20 = smov 4  }
  0x28   :  { %35 = dma.hbm_to_vmem [thread:$0]  %s3237_s0, 512, %s30_s17, [#allocation3], %s2573_s19, %s2573_s19, %s2574_s20  }
  0x29   :  { %s2575_s23 = smov [#allocation7]   ;;  %s2576_s5 = smov [#allocation10]  }
  0x2a   :  { %s53_s26 = sshll.u32 %s2575_s23, 4  ;;  %s83_s27 = sshll.u32 %s2576_s5, 4  ;;  %s54_s26 = int_to_ptr.vmem [resolvable:$true] %s53_s26  ;;  %s84_s27 = int_to_ptr.vmem [resolvable:$true] %s83_s27 }
  0x2b   :  { %s2462_s28 = scalar_lea.vmem %s54_s26, 3072  ;;  %p2467_p2 = scmp.lt.s32.totalorder %s54_s26, %s54_s26 }
  0x2c   :  { %p2463_p1 = scmp.ne.s32.totalorder %s54_s26, %s2462_s28  ;;  %p2468_p3 = scmp.lt.s32.totalorder %s2462_s28, %s2462_s28 }
  0x2e   :  { %p2469_p4 = por %p2468_p3, %p2467_p2 }
  0x30   :  { %p2470_p5 = pnand %p2469_p4, %p2463_p1 }
  0x32   :  { %2473 = shalt.err (!%p2470_p5)
}
  0x33   :  { %59 = dma.hbm_to_vmem [thread:$0]  %s3239_s2, 3072, %s54_s26, [#allocation6], %s2567_s24, %s2567_s24, %s2568_s25  }
  0x34   :  { %s2482_s0 = scalar_lea.vmem %s84_s27, 2048  ;;  %p2487_p7 = scmp.lt.s32.totalorder %s84_s27, %s84_s27 }
  0x35   :  { %p2483_p6 = scmp.ne.s32.totalorder %s84_s27, %s2482_s0  ;;  %p2488_p8 = scmp.lt.s32.totalorder %s2482_s0, %s2482_s0 }
  0x37   :  { %p2489_p9 = por %p2488_p8, %p2487_p7 }
  0x39   :  { %p2490_p10 = pnand %p2489_p9, %p2483_p6 }
  0x3b   :  { %2493 = shalt.err (!%p2490_p10)
}
  0x3c   :  { %89 = dma.hbm_to_vmem [thread:$0]  %s3244_s7, 2048, %s84_s27, [#allocation9], %s2570_s13, %s2570_s13, %s2571_s14  }
  0x3d   :  { %s2577_s1 = smov [#allocation11]  }
  0x3e   :  { %s97_s17 = sshll.u32 %s2577_s1, 4  ;;  %s98_s17 = int_to_ptr.vmem [resolvable:$true] %s97_s17 }
  0x3f   :  { %s2502_s18 = scalar_lea.vmem %s98_s17, 2048  ;;  %p2507_p12 = scmp.lt.s32.totalorder %s98_s17, %s98_s17 }
  0x40   :  { %p2503_p11 = scmp.ne.s32.totalorder %s98_s17, %s2502_s18  ;;  %p2508_p13 = scmp.lt.s32.totalorder %s2502_s18, %s2502_s18 }
  0x42   :  { %p2509_p0 = por %p2508_p13, %p2507_p12 }
  0x44   :  { %p2510_p1 = pnand %p2509_p0, %p2503_p11 }
  0x46   :  { %2513 = shalt.err (!%p2510_p1)
}
  0x47   :  { %103 = dma.hbm_to_vmem [thread:$0]  %s3246_s9, 2048, %s98_s17, [#allocation12], %s2570_s13, %s2570_s13, %s2571_s14  }
  0x48   :  { %2554 = dma.done.wait [#allocation3], 512  }
  0x49   :  { %2555 = vsyncadd [#allocation3], 4294966784 }
  0x4a   :  { %2556 = dma.done.wait [#allocation6], 4608  }
  0x4b   :  { %2557 = vsyncadd [#allocation6], 4294962688 }
  0x4c   :  { %2558 = dma.done.wait [#allocation9], 4096  }
  0x4d   :  { %2559 = vsyncadd [#allocation9], 4294963200 }
  0x4e   :  { %2560 = dma.done.wait [#allocation12], 2048  }
  0x4f   :  { %2561 = vsyncadd [#allocation12], 4294965248  ;;  %v3251_v0 = vmov 0   ;;  %v2239_v1 = vld [vmem:[#allocation5 + $0x4c] ss:$12 sps:$4 sm:$0xff]   ;;  %v2251_v6 = vld [vmem:[#allocation2] sm:$0xff]   ;;  %v3250_v42 = vlaneseq }
  0x50   :  { %295 = vmatprep.mubr.bf16.mxu0 %v3251_v0  ;;  %v2241_v2 = vld [vmem:[#allocation5 + $0x48] ss:$12 sps:$4 sm:$0xff]   ;;  %271 = vmatprep.subr.bf16.mxu0 %v2239_v1  ;;  %v2244_v4 = vld [vmem:[#allocation5 + $0x30] ss:$12 sps:$4 sm:$0xff]   ;;  %v2247_v7 = vld [vmem:[#allocation5 + $0x18] ss:$12 sps:$4 sm:$0xff]  }
  0x51   :  { %v2242_v3 = vld [vmem:[#allocation5 + $0x34] ss:$12 sps:$4 sm:$0xff]   ;;  %272 = vmatpush1.bf16.msra.mxu0 %v2241_v2  ;;  %v2245_v5 = vld [vmem:[#allocation5 + $0x1c] ss:$12 sps:$4 sm:$0xff]   ;;  %vm250_vm0 = vcmask 523264   ;;  %v3253_v25 = vmov 0.0  }
  0x52   :  { %273 = vmatprep.subr.bf16.mxu0 %v2242_v3  ;;  %v2248_v8 = vld [vmem:[#allocation5 + $0x4] ss:$12 sps:$4 sm:$0xff]   ;;  %1949 = vmatprep.mubr.msk.bf16.mxu1 %vm250_vm0, %v2251_v6  ;;  %v2250_v9 = vld [vmem:[#allocation5] ss:$12 sps:$4 sm:$0xff]   ;;  %v2685_v13 = vld [vmem:[#allocation7 + $0xa8] ss:$12 sps:$4 sm:$0xff]  }
  0x53   :  { %v2683_v10 = vld [vmem:[#allocation7 + $0xac] ss:$12 sps:$4 sm:$0xff]   ;;  %v2262_v11 = vld [vmem:[#allocation5 + $0x50] ss:$12 sps:$4 sm:$0xff]   ;;  %v2688_v14 = vld [vmem:[#allocation7 + $0x94] ss:$12 sps:$4 sm:$0xff]  }
  0x54   :  { %1941 = vmatprep.subr.bf16.mxu1 %v2262_v11  ;;  %v2266_v12 = vld [vmem:[#allocation5 + $0x38] ss:$12 sps:$4 sm:$0xff]   ;;  %v2271_v15 = vld [vmem:[#allocation5 + $0x20] ss:$12 sps:$4 sm:$0xff]   ;;  %v2692_v16 = vld [vmem:[#allocation7 + $0x90] ss:$12 sps:$4 sm:$0xff]  }
  0x55   :  { %274 = vmatpush1.bf16.msra.mxu0 %v2244_v4  ;;  %1942 = vmatpush3.bf16.msra.mxu1 %v2262_v11  ;;  %v2696_v17 = vld [vmem:[#allocation7 + $0x7c] ss:$12 sps:$4 sm:$0xff]   ;;  %v2699_v20 = vld [vmem:[#allocation7 + $0x78] ss:$12 sps:$4 sm:$0xff]   ;;  %v2705_v22 = vld [vmem:[#allocation7 + $0x60] ss:$12 sps:$4 sm:$0xff]  }
  0x56   :  { %275 = vmatprep.subr.bf16.mxu0 %v2245_v5  ;;  %1943 = vmatprep.subr.bf16.mxu1 %v2266_v12  ;;  %v2275_v18 = vld [vmem:[#allocation5 + $0x8] ss:$12 sps:$4 sm:$0xff]   ;;  %v2702_v21 = vld [vmem:[#allocation7 + $0x64] ss:$12 sps:$4 sm:$0xff]   ;;  %v2709_v23 = vld [vmem:[#allocation7 + $0x4c] ss:$12 sps:$4 sm:$0xff]  }
  0x57   :  { %v2258_v19 = vld [vmem:[#allocation2 + $0x8] sm:$0xff]   ;;  %v2712_v24 = vld [vmem:[#allocation7 + $0xb0] ss:$12 sps:$4 sm:$0xff]   ;;  %v2720_v28 = vld [vmem:[#allocation7 + $0x34] ss:$12 sps:$4 sm:$0xff]   ;;  %vm2580_vm1 = vmmov 0  }
  0x58   :  { %v2267_v26 = vld [vmem:[#allocation2 + $0x10] sm:$0xff]   ;;  %v2723_v29 = vld [vmem:[#allocation7 + $0x98] ss:$12 sps:$4 sm:$0xff]   ;;  %v2733_v31 = vld [vmem:[#allocation7 + $0x1c] ss:$12 sps:$4 sm:$0xff]   ;;  %v152_v43 = vshrl.u32 %v3250_v42, 7 }
  0x59   :  { %276 = vmatpush1.bf16.msra.mxu0 %v2247_v7  ;;  %1944 = vmatpush3.bf16.msra.mxu1 %v2266_v12  ;;  %v2716_v27 = vld [vmem:[#allocation7 + $0x48] ss:$12 sps:$4 sm:$0xff]   ;;  %v2729_v30 = vld [vmem:[#allocation7 + $0x30] ss:$12 sps:$4 sm:$0xff]   ;;  %v2736_v32 = vld [vmem:[#allocation7 + $0x80] ss:$12 sps:$4 sm:$0xff]  }
  0x5a   :  { %277 = vmatprep.subr.bf16.mxu0 %v2248_v8  ;;  %1945 = vmatprep.subr.bf16.mxu1 %v2271_v15  ;;  %v2276_v33 = vld [vmem:[#allocation2 + $0x18] sm:$0xff]   ;;  %v2744_v35 = vld [vmem:[#allocation7 + $0x4] ss:$12 sps:$4 sm:$0xff]   ;;  %v2747_v36 = vld [vmem:[#allocation7 + $0x68] ss:$12 sps:$4 sm:$0xff]   ;;  %v153_v44 = vsub.s32 0, %v152_v43 }
  0x5b   :  { %v2740_v34 = vld [vmem:[#allocation7 + $0x18] ss:$12 sps:$4 sm:$0xff]   ;;  %v2754_v37 = vld [vmem:[#allocation7] ss:$12 sps:$4 sm:$0xff]   ;;  %v2759_v38 = vld [vmem:[#allocation7 + $0x50] ss:$12 sps:$4 sm:$0xff]  }
  0x5c   :  { %v2764_v39 = vld [vmem:[#allocation7 + $0x38] ss:$12 sps:$4 sm:$0xff]   ;;  %v2772_v40 = vld [vmem:[#allocation7 + $0x20] ss:$12 sps:$4 sm:$0xff]   ;;  %v2778_v41 = vld [vmem:[#allocation7 + $0x8] ss:$12 sps:$4 sm:$0xff]  }
  0x5d   :  { %278 = vmatpush1.bf16.msra.mxu0 %v2250_v9  ;;  %1946 = vmatpush3.bf16.msra.mxu1 %v2271_v15  ;;  %v149_v45 = vld [vmem:[%s3240_s3] sm:$0x7]  ;;  %v157_v47 = vsub.s32 1, %v152_v43  ;;  %v161_v54 = vsub.s32 2, %v152_v43 }
  0x5e   :  { %568 = vmatprep.subr.bf16.mxu0 %v2683_v10  ;;  %1947 = vmatprep.subr.bf16.mxu1 %v2275_v18  ;;  %v154_v49 = vrot.slane %v149_v45, %v153_v44 }
  0x5f   :  { %v158_v51 = vrot.slane %v149_v45, %v157_v47  ;;  %v162_v59 = vrot.slane %v149_v45, %v161_v54 }
  0x60   :  { %1758 = vmatmul.mubr.msk.bf16.vlgmr.msra.gmra.mxu0 %vm250_vm0, %v2251_v6 }
  0x61   :  { %569 = vmatpush1.bf16.msra.mxu0 %v2685_v13  ;;  %305 = vmatprep.mubr.bf16.mxu0 %v3251_v0 }
  0x62   :  { %570 = vmatprep.subr.bf16.mxu0 %v2688_v14  ;;  %1948 = vmatpush3.bf16.msra.mxu1 %v2275_v18 }
  0x63   :  { %1957 = vmatprep.subr.bf16.mxu1 %v3253_v25 }
  0x65   :  { %571 = vmatpush1.bf16.msra.mxu0 %v2692_v16  ;;  %1950 = vmatmul.mubr.msk.bf16.vlgmr.msra.gmra.mxu1 %vm250_vm0, %v2258_v19 }
  0x66   :  { %572 = vmatprep.subr.bf16.mxu0 %v2696_v17  ;;  %1958 = vmatpush3.bf16.msra.mxu1 %v2712_v24 }
  0x67   :  { %1959 = vmatprep.subr.bf16.mxu1 %v3253_v25  ;;  %1953 = vmatprep.mubr.msk.bf16.mxu1 %vm250_vm0, %v2267_v26 }
  0x68   :  { %1759 = vmatmul.mubr.msk.bf16.gmra.mxu0 %vm250_vm0, %v2258_v19 }
  0x69   :  { %573 = vmatpush1.bf16.msra.mxu0 %v2699_v20  ;;  %315 = vmatprep.mubr.bf16.mxu0 %v3251_v0 }
  0x6a   :  { %574 = vmatprep.subr.bf16.mxu0 %v2702_v21  ;;  %1960 = vmatpush3.bf16.msra.mxu1 %v2723_v29 }
  0x6b   :  { %1961 = vmatprep.subr.bf16.mxu1 %v3253_v25 }
  0x6d   :  { %575 = vmatpush1.bf16.msra.mxu0 %v2705_v22  ;;  %1954 = vmatmul.mubr.msk.bf16.gmra.mxu1 %vm250_vm0, %v2276_v33 }
  0x6e   :  { %576 = vmatprep.subr.bf16.mxu0 %v2709_v23  ;;  %1962 = vmatpush3.bf16.msra.mxu1 %v2736_v32 }
  0x6f   :  { %1963 = vmatprep.subr.bf16.mxu1 %v3253_v25  ;;  %1973 = vmatprep.mubr.msk.bf16.mxu1 %vm2580_vm1, %v3253_v25 }
  0x70   :  { %1760 = vmatmul.mubr.msk.bf16.gmra.mxu0 %vm250_vm0, %v2267_v26 }
  0x71   :  { %577 = vmatpush1.bf16.msra.mxu0 %v2716_v27  ;;  %325 = vmatprep.mubr.bf16.mxu0 %v3251_v0 }
  0x72   :  { %578 = vmatprep.subr.bf16.mxu0 %v2720_v28  ;;  %1964 = vmatpush3.bf16.msra.mxu1 %v2747_v36 }
  0x73   :  { %1965 = vmatprep.subr.bf16.mxu1 %v3253_v25 }
  0x75   :  { %579 = vmatpush1.bf16.msra.mxu0 %v2729_v30 }
  0x76   :  { %580 = vmatprep.subr.bf16.mxu0 %v2733_v31  ;;  %1966 = vmatpush3.bf16.msra.mxu1 %v2759_v38 }
  0x77   :  { %1967 = vmatprep.subr.bf16.mxu1 %v3253_v25 }
  0x78   :  { %1761 = vmatmul.mubr.msk.bf16.gmra.mxu0 %vm250_vm0, %v2276_v33 }
  0x79   :  { %581 = vmatpush1.bf16.msra.mxu0 %v2740_v34  ;;  %600 = vmatprep.mubr.bf16.mxu0 %v3251_v0 }
  0x7a   :  { %582 = vmatprep.subr.bf16.mxu0 %v2744_v35  ;;  %1968 = vmatpush3.bf16.msra.mxu1 %v2764_v39 }
  0x7b   :  { %1969 = vmatprep.subr.bf16.mxu1 %v3253_v25 }
  0x7d   :  { %583 = vmatpush1.bf16.msra.mxu0 %v2754_v37 }
  0x7e   :  { %672 = vmatprep.subr.bf16.mxu0 %v2683_v10  ;;  %1970 = vmatpush3.bf16.msra.mxu1 %v2772_v40 }
  0x7f   :  { %1971 = vmatprep.subr.bf16.mxu1 %v3253_v25 }
  0x80   :  { %601 = vmatmul.mubr.bf16.vlgmr.msra.gmra.mxu0 %v3251_v0 }
  0x81   :  { %673 = vmatpush1.bf16.msra.mxu0 %v2685_v13  ;;  %704 = vmatprep.mubr.bf16.mxu0 %v3251_v0 }
  0x82   :  { %674 = vmatprep.subr.bf16.mxu0 %v2688_v14  ;;  %1972 = vmatpush3.bf16.msra.mxu1 %v2778_v41 }
  0x83   :  { %1977 = vmatprep.subr.bf16.mxu1 %v3253_v25 }
  0x85   :  { %675 = vmatpush1.bf16.msra.mxu0 %v2692_v16  ;;  %1974 = vmatmul.mubr.bf16.vlgmr.msra.gmra.mxu1 %v3251_v0 }
  0x86   :  { %676 = vmatprep.subr.bf16.mxu0 %v2696_v17  ;;  %1978 = vmatpush3.bf16.msra.mxu1 %v2712_v24 }
  0x87   :  { %1979 = vmatprep.subr.bf16.mxu1 %v3253_v25  ;;  %1993 = vmatprep.mubr.msk.bf16.mxu1 %vm2580_vm1, %v3253_v25 }
  0x89   :  { %677 = vmatpush1.bf16.msra.mxu0 %v2699_v20 }
  0x8a   :  { %678 = vmatprep.subr.bf16.mxu0 %v2702_v21  ;;  %1980 = vmatpush3.bf16.msra.mxu1 %v2723_v29 }
  0x8b   :  { %1981 = vmatprep.subr.bf16.mxu1 %v3253_v25 }
  0x8d   :  { %679 = vmatpush1.bf16.msra.mxu0 %v2705_v22 }
  0x8e   :  { %680 = vmatprep.subr.bf16.mxu0 %v2709_v23  ;;  %1982 = vmatpush3.bf16.msra.mxu1 %v2736_v32 }
  0x8f   :  { %1983 = vmatprep.subr.bf16.mxu1 %v3253_v25 }
  0x91   :  { %681 = vmatpush1.bf16.msra.mxu0 %v2716_v27 }
  0x92   :  { %682 = vmatprep.subr.bf16.mxu0 %v2720_v28  ;;  %1984 = vmatpush3.bf16.msra.mxu1 %v2747_v36 }
  0x93   :  { %1985 = vmatprep.subr.bf16.mxu1 %v3253_v25 }
  0x95   :  { %683 = vmatpush1.bf16.msra.mxu0 %v2729_v30 }
  0x96   :  { %684 = vmatprep.subr.bf16.mxu0 %v2733_v31  ;;  %1986 = vmatpush3.bf16.msra.mxu1 %v2759_v38 }
  0x97   :  { %1987 = vmatprep.subr.bf16.mxu1 %v3253_v25 }
  0x99   :  { %685 = vmatpush1.bf16.msra.mxu0 %v2740_v34 }
  0x9a   :  { %686 = vmatprep.subr.bf16.mxu0 %v2744_v35  ;;  %1988 = vmatpush3.bf16.msra.mxu1 %v2764_v39 }
  0x9b   :  { %1989 = vmatprep.subr.bf16.mxu1 %v3253_v25 }
  0x9d   :  { %687 = vmatpush1.bf16.msra.mxu0 %v2754_v37 }
  0x9e   :  { %776 = vmatprep.subr.bf16.mxu0 %v2683_v10  ;;  %1990 = vmatpush3.bf16.msra.mxu1 %v2772_v40 }
  0x9f   :  { %1991 = vmatprep.subr.bf16.mxu1 %v3253_v25 }
  0xa2   :  { %1992 = vmatpush3.bf16.msra.mxu1 %v2778_v41 }
  0xa3   :  { %1997 = vmatprep.subr.bf16.mxu1 %v3253_v25 }
 0x120   :  { %v297_v46 = vpop.f32.mrf.mxu0 }
 0x122   :  { %v299_v48 = vpop.f32.mrf.mxu0 }
 0x123   :  { %v300_v0 = vadd.f32 %v299_v48, %v158_v51 }
 0x124   :  { %v301_v50 = vpop.f32.mrf.mxu0 }
 0x125   :  { %v2819_v52 = vadd.f32 %v301_v50, %v154_v49  ;;  %v1951_v63 = vpop.f32.mrf.mxu1 }
 0x126   :  { %v303_v53 = vpop.f32.mrf.mxu0  ;;  %v2829_v2 = vadd.f32 %v1951_v63, %v162_v59 }
 0x127   :  { %v2821_v55 = vadd.f32 %v303_v53, %v158_v51  ;;  %v370_v4 = vpop.f32.mrf.mxu1 }
 0x128   :  { %v307_v56 = vpop.f32.mrf.mxu0 }
 0x129   :  { %v2823_v57 = vadd.f32 %v307_v56, %v154_v49  ;;  %v1952_v7 = vpop.f32.mrf.mxu1 }
 0x12a   :  { %v309_v58 = vpop.f32.mrf.mxu0  ;;  %v2835_v9 = vadd.f32 %v1952_v7, %v162_v59 }
 0x12b   :  { %v2825_v60 = vadd.f32 %v309_v58, %v158_v51  ;;  %v373_v12 = vpop.f32.mrf.mxu1 }
 0x12c   :  { %v311_v61 = vpop.f32.mrf.mxu0  ;;  %v2839_v18 = vadd.f32 %v373_v12, %v162_v59  ;;  %v298_v12 = vadd.f32 %v297_v46, %v154_v49 }
 0x12d   :  { %v2827_v62 = vadd.f32 %v311_v61, %v154_v49  ;;  %v1955_v26 = vpop.f32.mrf.mxu1 }
 0x12e   :  { %v313_v1 = vpop.f32.mrf.mxu0  ;;  %v2843_v43 = vadd.f32 %v1955_v26, %v162_v59 }
 0x12f   :  { %v2831_v3 = vadd.f32 %v313_v1, %v158_v51  ;;  %v386_v45 = vpop.f32.mrf.mxu1 }
 0x130   :  { %v317_v5 = vpop.f32.mrf.mxu0  ;;  %3255 = vst [vmem:[#allocation22_spill] sm:$0xff] %v2843_v43  ;;  %v2847_v50 = vadd.f32 %v386_v45, %v162_v59 }
 0x131   :  { %v2833_v6 = vadd.f32 %v317_v5, %v154_v49  ;;  %v1956_v54 = vpop.f32.mrf.mxu1 }
 0x132   :  { %v319_v8 = vpop.f32.mrf.mxu0  ;;  %v2851_v58 = vadd.f32 %v1956_v54, %v162_v59 }
 0x133   :  { %v2837_v11 = vadd.f32 %v319_v8, %v158_v51  ;;  %v389_v63 = vpop.f32.mrf.mxu1 }
 0x134   :  { %v321_v15 = vpop.f32.mrf.mxu0  ;;  %3256 = vst [vmem:[#allocation23_spill] sm:$0xff] %v2851_v58  ;;  %v2855_v5 = vadd.f32 %v389_v63, %v162_v59 }
 0x135   :  { %v2841_v19 = vadd.f32 %v321_v15, %v154_v49 }
 0x136   :  { %v323_v33 = vpop.f32.mrf.mxu0 }
 0x137   :  { %v2845_v44 = vadd.f32 %v323_v33, %v158_v51 }
 0x138   :  { %v327_v47 = vpop.f32.mrf.mxu0 }
 0x139   :  { %v2849_v53 = vadd.f32 %v327_v47, %v154_v49 }
 0x13a   :  { %v329_v56 = vpop.f32.mrf.mxu0 }
 0x13b   :  { %v2853_v61 = vadd.f32 %v329_v56, %v158_v51 }
 0x13c   :  { %v331_v1 = vpop.f32.mrf.mxu0 }
 0x13d   :  { %3257 = vst [vmem:[#allocation24_spill] sm:$0xff] %v2853_v61  ;;  %v2857_v7 = vadd.f32 %v331_v1, %v154_v49  ;;  %v2864_v49 = vld [vmem:[%s3241_s4] ss:$0 sm:$0xff] }
 0x13e   :  { %v333_v8 = vpop.f32.mrf.mxu0 }
 0x13f   :  { %3258 = vst [vmem:[#allocation25_spill] sm:$0xff] %v2857_v7  ;;  %v2859_v15 = vadd.f32 %v333_v8, %v158_v51 }
 0x140   :  { %v602_v26 = vpop.f32.mrf.mxu0 }
 0x141   :  { %v649_v33 = vadd.f32 %v602_v26, %v298_v12 }
 0x142   :  { %v604_v45 = vpop.f32.mrf.mxu0 }
 0x143   :  { %v1791_v47 = vmul.f32 -1.442695, %v649_v33  ;;  %v656_v56 = vadd.f32 %v604_v45, %v300_v0  ;;  %v371_v0 = vadd.f32 %v370_v4, %v162_v59  ;;  %v3259_v59 = vmov 0.0  }
 0x144   :  { %v606_v42 = vpop.f32.mrf.mxu0  ;;  %v3260_v4 = vmov 0  }
 0x145   :  { %2291 = vpow2.f32 %v1791_v47  ;;  %v1792_v25 = vmul.f32 -1.442695, %v656_v56  ;;  %v643_v58 = vpop.f32.mrf.mxu1 }
 0x146   :  { %v607_v54 = vpop.f32.mrf.mxu0  ;;  %v663_v48 = vadd.f32 %v2864_v49, %v643_v58 }
 0x147   :  { %2293 = vpow2.f32 %v1792_v25  ;;  %v1975_v63 = vpop.f32.mrf.mxu1 }
 0x149   :  { %v646_v43 = vpop.f32.mrf.mxu1 }
 0x14b   :  { %v1976_v61 = vpop.f32.mrf.mxu1 }
 0x152   :  { %v2292_v1 = vpop.eup %2291 }
 0x153   :  { %v653_v7 = vadd.f32 1.0, %v2292_v1 }
 0x154   :  { %v2294_v46 = vpop.eup %2293 }
 0x155   :  { %2295 = vrcp.f32 %v653_v7  ;;  %v660_v42 = vadd.f32 1.0, %v2294_v46 }
 0x157   :  { %2297 = vrcp.f32 %v660_v42 }
 0x162   :  { %v2296_v51 = vpop.eup %2295 }
 0x163   :  { %v664_v8 = vmul.f32 %v2296_v51, %v663_v48 }
 0x164   :  { %v2298_v43 = vpop.eup %2297 }
 0x165   :  { %v665_v25 = vadd.f32 %v664_v8, %v371_v0  ;;  %v667_v12 = vsub.f32 1.0, %v2298_v43  ;;  %v669_v61 = vmul.f32 0.0, %v2298_v43 }
 0x167   :  { %2299 = vtanh.f32 %v665_v25 }
 0x174   :  { %v2300_v26 = vpop.eup %2299 }
 0x175   :  { %v668_v7 = vmul.f32 %v2300_v26, %v667_v12 }
 0x177   :  { %v2867_v33 = vadd.f32 %v669_v61, %v668_v7 }
 0x179   :  { %v671_v45 = vpack.c.bf16 %v2867_v33, %v2867_v33 }
 0x17b   :  { %705 = vmatmul.mubr.bf16.vlgmr.msra.gmra.mxu0 %v671_v45  ;;  %1994 = vmatmul.mubr.bf16.vlgmr.msra.gmra.mxu1 %v671_v45 }
 0x17c   :  { %777 = vmatpush1.bf16.msra.mxu0 %v2685_v13  ;;  %1998 = vmatpush3.bf16.msra.mxu1 %v2712_v24 }
 0x17d   :  { %778 = vmatprep.subr.bf16.mxu0 %v2688_v14  ;;  %1999 = vmatprep.subr.bf16.mxu1 %v3259_v59 }
 0x17e   :  { %808 = vmatprep.mubr.bf16.mxu0 %v3260_v4  ;;  %2013 = vmatprep.mubr.msk.bf16.mxu1 %vm2580_vm1, %v3259_v59 }
 0x180   :  { %779 = vmatpush1.bf16.msra.mxu0 %v2692_v16  ;;  %2000 = vmatpush3.bf16.msra.mxu1 %v2723_v29 }
 0x181   :  { %780 = vmatprep.subr.bf16.mxu0 %v2696_v17  ;;  %2001 = vmatprep.subr.bf16.mxu1 %v3259_v59 }
 0x184   :  { %781 = vmatpush1.bf16.msra.mxu0 %v2699_v20  ;;  %2002 = vmatpush3.bf16.msra.mxu1 %v2736_v32 }
 0x185   :  { %782 = vmatprep.subr.bf16.mxu0 %v2702_v21  ;;  %2003 = vmatprep.subr.bf16.mxu1 %v3259_v59 }
 0x188   :  { %783 = vmatpush1.bf16.msra.mxu0 %v2705_v22  ;;  %2004 = vmatpush3.bf16.msra.mxu1 %v2747_v36 }
 0x189   :  { %784 = vmatprep.subr.bf16.mxu0 %v2709_v23  ;;  %2005 = vmatprep.subr.bf16.mxu1 %v3259_v59 }
 0x18c   :  { %785 = vmatpush1.bf16.msra.mxu0 %v2716_v27  ;;  %2006 = vmatpush3.bf16.msra.mxu1 %v2759_v38 }
 0x18d   :  { %786 = vmatprep.subr.bf16.mxu0 %v2720_v28  ;;  %2007 = vmatprep.subr.bf16.mxu1 %v3259_v59 }
 0x190   :  { %787 = vmatpush1.bf16.msra.mxu0 %v2729_v30  ;;  %2008 = vmatpush3.bf16.msra.mxu1 %v2764_v39 }
 0x191   :  { %788 = vmatprep.subr.bf16.mxu0 %v2733_v31  ;;  %2009 = vmatprep.subr.bf16.mxu1 %v3259_v59 }
 0x194   :  { %789 = vmatpush1.bf16.msra.mxu0 %v2740_v34  ;;  %2010 = vmatpush3.bf16.msra.mxu1 %v2772_v40 }
 0x195   :  { %790 = vmatprep.subr.bf16.mxu0 %v2744_v35  ;;  %2011 = vmatprep.subr.bf16.mxu1 %v3259_v59 }
 0x198   :  { %791 = vmatpush1.bf16.msra.mxu0 %v2754_v37  ;;  %2012 = vmatpush3.bf16.msra.mxu1 %v2778_v41 }
 0x199   :  { %880 = vmatprep.subr.bf16.mxu0 %v2683_v10  ;;  %2017 = vmatprep.subr.bf16.mxu1 %v3259_v59 }
 0x23b   :  { %v706_v58 = vpop.f32.mrf.mxu0  ;;  %v747_v47 = vpop.f32.mrf.mxu1 }
 0x23c   :  { %v753_v54 = vadd.f32 %v706_v58, %v2819_v52  ;;  %v767_v61 = vadd.f32 %v2864_v49, %v747_v47 }
 0x23d   :  { %v708_v56 = vpop.f32.mrf.mxu0  ;;  %v1995_v63 = vpop.f32.mrf.mxu1 }
 0x23e   :  { %v1793_v1 = vmul.f32 -1.442695, %v753_v54  ;;  %v760_v0 = vadd.f32 %v708_v56, %v2821_v55 }
 0x23f   :  { %v710_v46 = vpop.f32.mrf.mxu0  ;;  %v750_v42 = vpop.f32.mrf.mxu1 }
 0x240   :  { %2301 = vpow2.f32 %v1793_v1  ;;  %v1794_v8 = vmul.f32 -1.442695, %v760_v0 }
 0x241   :  { %v711_v48 = vpop.f32.mrf.mxu0  ;;  %v1996_v51 = vpop.f32.mrf.mxu1 }
 0x242   :  { %2303 = vpow2.f32 %v1794_v8 }
 0x24d   :  { %v2302_v25 = vpop.eup %2301 }
 0x24e   :  { %v757_v43 = vadd.f32 1.0, %v2302_v25 }
 0x24f   :  { %v2304_v12 = vpop.eup %2303 }
 0x250   :  { %2305 = vrcp.f32 %v757_v43  ;;  %v764_v26 = vadd.f32 1.0, %v2304_v12 }
 0x252   :  { %2307 = vrcp.f32 %v764_v26 }
 0x25d   :  { %v2306_v52 = vpop.eup %2305 }
 0x25e   :  { %v768_v7 = vmul.f32 %v2306_v52, %v767_v61 }
 0x25f   :  { %v2308_v58 = vpop.eup %2307 }
 0x260   :  { %v769_v45 = vadd.f32 %v768_v7, %v2839_v18  ;;  %v771_v54 = vsub.f32 1.0, %v2308_v58  ;;  %v773_v55 = vmul.f32 %v2308_v58, %v2867_v33 }
 0x262   :  { %2309 = vtanh.f32 %v769_v45 }
 0x26f   :  { %v2310_v63 = vpop.eup %2309 }
 0x270   :  { %v772_v1 = vmul.f32 %v2310_v63, %v771_v54 }
 0x272   :  { %v2911_v56 = vadd.f32 %v773_v55, %v772_v1 }
 0x274   :  { %v775_v46 = vpack.c.bf16 %v2911_v56, %v2911_v56 }
 0x276   :  { %809 = vmatmul.mubr.bf16.vlgmr.msra.gmra.mxu0 %v775_v46  ;;  %2014 = vmatmul.mubr.bf16.vlgmr.msra.gmra.mxu1 %v775_v46 }
 0x277   :  { %881 = vmatpush1.bf16.msra.mxu0 %v2685_v13  ;;  %2018 = vmatpush3.bf16.msra.mxu1 %v2712_v24 }
 0x278   :  { %882 = vmatprep.subr.bf16.mxu0 %v2688_v14  ;;  %2019 = vmatprep.subr.bf16.mxu1 %v3259_v59 }
 0x279   :  { %912 = vmatprep.mubr.bf16.mxu0 %v3260_v4  ;;  %2033 = vmatprep.mubr.msk.bf16.mxu1 %vm2580_vm1, %v3259_v59 }
 0x27b   :  { %883 = vmatpush1.bf16.msra.mxu0 %v2692_v16  ;;  %2020 = vmatpush3.bf16.msra.mxu1 %v2723_v29 }
 0x27c   :  { %884 = vmatprep.subr.bf16.mxu0 %v2696_v17  ;;  %2021 = vmatprep.subr.bf16.mxu1 %v3259_v59 }
 0x27f   :  { %885 = vmatpush1.bf16.msra.mxu0 %v2699_v20  ;;  %2022 = vmatpush3.bf16.msra.mxu1 %v2736_v32 }
 0x280   :  { %886 = vmatprep.subr.bf16.mxu0 %v2702_v21  ;;  %2023 = vmatprep.subr.bf16.mxu1 %v3259_v59 }
 0x283   :  { %887 = vmatpush1.bf16.msra.mxu0 %v2705_v22  ;;  %2024 = vmatpush3.bf16.msra.mxu1 %v2747_v36 }
 0x284   :  { %888 = vmatprep.subr.bf16.mxu0 %v2709_v23  ;;  %2025 = vmatprep.subr.bf16.mxu1 %v3259_v59 }
 0x287   :  { %889 = vmatpush1.bf16.msra.mxu0 %v2716_v27  ;;  %2026 = vmatpush3.bf16.msra.mxu1 %v2759_v38 }
 0x288   :  { %890 = vmatprep.subr.bf16.mxu0 %v2720_v28  ;;  %2027 = vmatprep.subr.bf16.mxu1 %v3259_v59 }
 0x28b   :  { %891 = vmatpush1.bf16.msra.mxu0 %v2729_v30  ;;  %2028 = vmatpush3.bf16.msra.mxu1 %v2764_v39 }
 0x28c   :  { %892 = vmatprep.subr.bf16.mxu0 %v2733_v31  ;;  %2029 = vmatprep.subr.bf16.mxu1 %v3259_v59 }
 0x28f   :  { %893 = vmatpush1.bf16.msra.mxu0 %v2740_v34  ;;  %2030 = vmatpush3.bf16.msra.mxu1 %v2772_v40 }
 0x290   :  { %894 = vmatprep.subr.bf16.mxu0 %v2744_v35  ;;  %2031 = vmatprep.subr.bf16.mxu1 %v3259_v59 }
 0x293   :  { %895 = vmatpush1.bf16.msra.mxu0 %v2754_v37  ;;  %2032 = vmatpush3.bf16.msra.mxu1 %v2778_v41 }
 0x294   :  { %984 = vmatprep.subr.bf16.mxu0 %v2683_v10  ;;  %2037 = vmatprep.subr.bf16.mxu1 %v3259_v59 }
 0x336   :  { %v810_v18 = vpop.f32.mrf.mxu0  ;;  %v851_v47 = vpop.f32.mrf.mxu1 }
 0x337   :  { %v857_v42 = vadd.f32 %v810_v18, %v2823_v57  ;;  %v871_v54 = vadd.f32 %v2864_v49, %v851_v47 }
 0x338   :  { %v812_v48 = vpop.f32.mrf.mxu0  ;;  %v2015_v51 = vpop.f32.mrf.mxu1 }
 0x339   :  { %v1795_v0 = vmul.f32 -1.442695, %v857_v42  ;;  %v864_v26 = vadd.f32 %v812_v48, %v2825_v60 }
 0x33a   :  { %v814_v8 = vpop.f32.mrf.mxu0  ;;  %v854_v25 = vpop.f32.mrf.mxu1 }
 0x33b   :  { %2311 = vpow2.f32 %v1795_v0  ;;  %v1796_v61 = vmul.f32 -1.442695, %v864_v26 }
 0x33c   :  { %v815_v43 = vpop.f32.mrf.mxu0  ;;  %v2016_v12 = vpop.f32.mrf.mxu1 }
 0x33d   :  { %2313 = vpow2.f32 %v1796_v61 }
 0x348   :  { %v2312_v52 = vpop.eup %2311 }
 0x349   :  { %v861_v7 = vadd.f32 1.0, %v2312_v52 }
 0x34a   :  { %v2314_v45 = vpop.eup %2313 }
 0x34b   :  { %2315 = vrcp.f32 %v861_v7  ;;  %v868_v58 = vadd.f32 1.0, %v2314_v45 }
 0x34d   :  { %2317 = vrcp.f32 %v868_v58 }
 0x358   :  { %v2316_v57 = vpop.eup %2315 }
 0x359   :  { %v872_v63 = vmul.f32 %v2316_v57, %v871_v54 }
 0x35a   :  { %v2318_v55 = vpop.eup %2317 }
 0x35b   :  { %v873_v1 = vadd.f32 %v872_v63, %v2829_v2  ;;  %v875_v46 = vsub.f32 1.0, %v2318_v55  ;;  %v877_v60 = vmul.f32 %v2318_v55, %v2911_v56 }
 0x35d   :  { %2319 = vtanh.f32 %v873_v1 }
 0x36a   :  { %v2320_v18 = vpop.eup %2319 }
 0x36b   :  { %v876_v42 = vmul.f32 %v2320_v18, %v875_v46 }
 0x36d   :  { %v2955_v48 = vadd.f32 %v877_v60, %v876_v42 }
 0x36f   :  { %v879_v51 = vpack.c.bf16 %v2955_v48, %v2955_v48 }
 0x371   :  { %913 = vmatmul.mubr.bf16.vlgmr.msra.gmra.mxu0 %v879_v51  ;;  %2034 = vmatmul.mubr.bf16.vlgmr.msra.gmra.mxu1 %v879_v51 }
 0x372   :  { %985 = vmatpush1.bf16.msra.mxu0 %v2685_v13  ;;  %2038 = vmatpush3.bf16.msra.mxu1 %v2712_v24 }
 0x373   :  { %986 = vmatprep.subr.bf16.mxu0 %v2688_v14  ;;  %2039 = vmatprep.subr.bf16.mxu1 %v3259_v59 }
 0x374   :  { %1016 = vmatprep.mubr.bf16.mxu0 %v3260_v4  ;;  %2053 = vmatprep.mubr.msk.bf16.mxu1 %vm2580_vm1, %v3259_v59 }
 0x376   :  { %987 = vmatpush1.bf16.msra.mxu0 %v2692_v16  ;;  %2040 = vmatpush3.bf16.msra.mxu1 %v2723_v29 }
 0x377   :  { %988 = vmatprep.subr.bf16.mxu0 %v2696_v17  ;;  %2041 = vmatprep.subr.bf16.mxu1 %v3259_v59 }
 0x37a   :  { %989 = vmatpush1.bf16.msra.mxu0 %v2699_v20  ;;  %2042 = vmatpush3.bf16.msra.mxu1 %v2736_v32 }
 0x37b   :  { %990 = vmatprep.subr.bf16.mxu0 %v2702_v21  ;;  %2043 = vmatprep.subr.bf16.mxu1 %v3259_v59 }
 0x37e   :  { %991 = vmatpush1.bf16.msra.mxu0 %v2705_v22  ;;  %2044 = vmatpush3.bf16.msra.mxu1 %v2747_v36 }
 0x37f   :  { %992 = vmatprep.subr.bf16.mxu0 %v2709_v23  ;;  %2045 = vmatprep.subr.bf16.mxu1 %v3259_v59 }
 0x382   :  { %993 = vmatpush1.bf16.msra.mxu0 %v2716_v27  ;;  %2046 = vmatpush3.bf16.msra.mxu1 %v2759_v38 }
 0x383   :  { %994 = vmatprep.subr.bf16.mxu0 %v2720_v28  ;;  %2047 = vmatprep.subr.bf16.mxu1 %v3259_v59 }
 0x386   :  { %995 = vmatpush1.bf16.msra.mxu0 %v2729_v30  ;;  %2048 = vmatpush3.bf16.msra.mxu1 %v2764_v39 }
 0x387   :  { %996 = vmatprep.subr.bf16.mxu0 %v2733_v31  ;;  %2049 = vmatprep.subr.bf16.mxu1 %v3259_v59 }
 0x38a   :  { %997 = vmatpush1.bf16.msra.mxu0 %v2740_v34  ;;  %2050 = vmatpush3.bf16.msra.mxu1 %v2772_v40 }
 0x38b   :  { %998 = vmatprep.subr.bf16.mxu0 %v2744_v35  ;;  %2051 = vmatprep.subr.bf16.mxu1 %v3259_v59 }
 0x38e   :  { %999 = vmatpush1.bf16.msra.mxu0 %v2754_v37  ;;  %2052 = vmatpush3.bf16.msra.mxu1 %v2778_v41 }
 0x38f   :  { %1088 = vmatprep.subr.bf16.mxu0 %v2683_v10  ;;  %2057 = vmatprep.subr.bf16.mxu1 %v3259_v59 }
 0x431   :  { %v914_v2 = vpop.f32.mrf.mxu0  ;;  %v955_v47 = vpop.f32.mrf.mxu1 }
 0x432   :  { %v961_v0 = vadd.f32 %v914_v2, %v2827_v62  ;;  %v975_v1 = vadd.f32 %v2864_v49, %v955_v47 }
 0x433   :  { %v916_v8 = vpop.f32.mrf.mxu0  ;;  %v2035_v25 = vpop.f32.mrf.mxu1 }
 0x434   :  { %v1797_v43 = vmul.f32 -1.442695, %v961_v0  ;;  %v968_v7 = vadd.f32 %v916_v8, %v2831_v3 }
 0x435   :  { %v918_v12 = vpop.f32.mrf.mxu0  ;;  %v958_v26 = vpop.f32.mrf.mxu1 }
 0x436   :  { %2321 = vpow2.f32 %v1797_v43  ;;  %v1798_v45 = vmul.f32 -1.442695, %v968_v7 }
 0x437   :  { %v919_v61 = vpop.f32.mrf.mxu0  ;;  %v2036_v52 = vpop.f32.mrf.mxu1 }
 0x438   :  { %2323 = vpow2.f32 %v1798_v45 }
 0x443   :  { %v2322_v58 = vpop.eup %2321 }
 0x444   :  { %v965_v54 = vadd.f32 1.0, %v2322_v58 }
 0x445   :  { %v2324_v57 = vpop.eup %2323 }
 0x446   :  { %2325 = vrcp.f32 %v965_v54  ;;  %v972_v63 = vadd.f32 1.0, %v2324_v57 }
 0x448   :  { %2327 = vrcp.f32 %v972_v63 }
 0x453   :  { %v2326_v62 = vpop.eup %2325 }
 0x454   :  { %v976_v55 = vmul.f32 %v2326_v62, %v975_v1 }
 0x455   :  { %v2328_v18 = vpop.eup %2327 }
 0x456   :  { %v977_v46 = vadd.f32 %v976_v55, %v2835_v9  ;;  %v979_v42 = vsub.f32 1.0, %v2328_v18  ;;  %v981_v3 = vmul.f32 %v2328_v18, %v2955_v48  ;;  %v3261_v55 = vlaneseq }
 0x458   :  { %2329 = vtanh.f32 %v977_v46  ;;  %v3043_v46 = vand.u32 127, %v3261_v55  ;;  %v2386_v55 = vld [vmem:[#allocation7 + $0x34] ss:$12 sps:$4 sm:$0xff]  }
 0x45a   :  { %vm1401_vm2 = vcmp.lt.s32.totalorder %v3043_v46, 64  ;;  %v1629_v46 = vld [vmem:[#allocation11 + $0x78] sm:$0xff] }
 0x465   :  { %v2330_v60 = vpop.eup %2329 }
 0x466   :  { %v980_v51 = vmul.f32 %v2330_v60, %v979_v42 }
 0x468   :  { %v2999_v2 = vadd.f32 %v981_v3, %v980_v51 }
 0x46a   :  { %v983_v0 = vpack.c.bf16 %v2999_v2, %v2999_v2 }
 0x46c   :  { %1017 = vmatmul.mubr.bf16.vlgmr.msra.gmra.mxu0 %v983_v0  ;;  %2054 = vmatmul.mubr.bf16.vlgmr.msra.gmra.mxu1 %v983_v0 }
 0x46d   :  { %1089 = vmatpush1.bf16.msra.mxu0 %v2685_v13  ;;  %2058 = vmatpush3.bf16.msra.mxu1 %v2712_v24 }
 0x46e   :  { %1090 = vmatprep.subr.bf16.mxu0 %v2688_v14  ;;  %2059 = vmatprep.subr.bf16.mxu1 %v3259_v59 }
 0x46f   :  { %1120 = vmatprep.mubr.bf16.mxu0 %v3260_v4  ;;  %2073 = vmatprep.mubr.msk.bf16.mxu1 %vm2580_vm1, %v3259_v59 }
 0x471   :  { %1091 = vmatpush1.bf16.msra.mxu0 %v2692_v16  ;;  %2060 = vmatpush3.bf16.msra.mxu1 %v2723_v29 }
 0x472   :  { %1092 = vmatprep.subr.bf16.mxu0 %v2696_v17  ;;  %2061 = vmatprep.subr.bf16.mxu1 %v3259_v59 }
 0x475   :  { %1093 = vmatpush1.bf16.msra.mxu0 %v2699_v20  ;;  %2062 = vmatpush3.bf16.msra.mxu1 %v2736_v32 }
 0x476   :  { %1094 = vmatprep.subr.bf16.mxu0 %v2702_v21  ;;  %2063 = vmatprep.subr.bf16.mxu1 %v3259_v59 }
 0x479   :  { %1095 = vmatpush1.bf16.msra.mxu0 %v2705_v22  ;;  %2064 = vmatpush3.bf16.msra.mxu1 %v2747_v36 }
 0x47a   :  { %1096 = vmatprep.subr.bf16.mxu0 %v2709_v23  ;;  %2065 = vmatprep.subr.bf16.mxu1 %v3259_v59 }
 0x47d   :  { %1097 = vmatpush1.bf16.msra.mxu0 %v2716_v27  ;;  %2066 = vmatpush3.bf16.msra.mxu1 %v2759_v38 }
 0x47e   :  { %1098 = vmatprep.subr.bf16.mxu0 %v2720_v28  ;;  %2067 = vmatprep.subr.bf16.mxu1 %v3259_v59 }
 0x481   :  { %1099 = vmatpush1.bf16.msra.mxu0 %v2729_v30  ;;  %2068 = vmatpush3.bf16.msra.mxu1 %v2764_v39 }
 0x482   :  { %1100 = vmatprep.subr.bf16.mxu0 %v2733_v31  ;;  %2069 = vmatprep.subr.bf16.mxu1 %v3259_v59 }
 0x485   :  { %1101 = vmatpush1.bf16.msra.mxu0 %v2740_v34  ;;  %2070 = vmatpush3.bf16.msra.mxu1 %v2772_v40 }
 0x486   :  { %1102 = vmatprep.subr.bf16.mxu0 %v2744_v35  ;;  %2071 = vmatprep.subr.bf16.mxu1 %v3259_v59 }
 0x489   :  { %1103 = vmatpush1.bf16.msra.mxu0 %v2754_v37  ;;  %2072 = vmatpush3.bf16.msra.mxu1 %v2778_v41 }
 0x48a   :  { %1192 = vmatprep.subr.bf16.mxu0 %v2683_v10  ;;  %2077 = vmatprep.subr.bf16.mxu1 %v3259_v59 }
 0x52c   :  { %v1018_v13 = vpop.f32.mrf.mxu0  ;;  %v1059_v14 = vpop.f32.mrf.mxu1 }
 0x52d   :  { %v1065_v9 = vadd.f32 %v1018_v13, %v2833_v6  ;;  %v1079_v57 = vadd.f32 %v2864_v49, %v1059_v14  ;;  %v3059_v13 = vld [vmem:[#allocation7 + $0xa8] ss:$12 sps:$4 sm:$0xff]  }
 0x52e   :  { %v1020_v47 = vpop.f32.mrf.mxu0  ;;  %v2055_v8 = vpop.f32.mrf.mxu1  ;;  %v3063_v14 = vld [vmem:[#allocation7 + $0x94] ss:$12 sps:$4 sm:$0xff]  }
 0x52f   :  { %v1799_v25 = vmul.f32 -1.442695, %v1065_v9  ;;  %v1072_v52 = vadd.f32 %v1020_v47, %v2837_v11 }
 0x530   :  { %v1022_v43 = vpop.f32.mrf.mxu0  ;;  %v1062_v12 = vpop.f32.mrf.mxu1 }
 0x531   :  { %2331 = vpow2.f32 %v1799_v25  ;;  %v1800_v7 = vmul.f32 -1.442695, %v1072_v52  ;;  %v2374_v52 = vld [vmem:[#allocation7 + $0xb0] ss:$12 sps:$4 sm:$0xff]  }
 0x532   :  { %v1023_v26 = vpop.f32.mrf.mxu0  ;;  %v2056_v61 = vpop.f32.mrf.mxu1 }
 0x533   :  { %2333 = vpow2.f32 %v1800_v7  ;;  %v2375_v7 = vld [vmem:[#allocation7 + $0x90] ss:$12 sps:$4 sm:$0xff]  }
 0x53e   :  { %v2332_v45 = vpop.eup %2331 }
 0x53f   :  { %v1069_v10 = vadd.f32 1.0, %v2332_v45  ;;  %v2376_v45 = vld [vmem:[#allocation7 + $0x98] ss:$12 sps:$4 sm:$0xff]  }
 0x540   :  { %v2334_v58 = vpop.eup %2333 }
 0x541   :  { %2335 = vrcp.f32 %v1069_v10  ;;  %v1076_v54 = vadd.f32 1.0, %v2334_v58  ;;  %v2377_v10 = vld [vmem:[#allocation7 + $0x7c] ss:$12 sps:$4 sm:$0xff]   ;;  %v2378_v58 = vld [vmem:[#allocation7 + $0x78] ss:$12 sps:$4 sm:$0xff]  }
 0x543   :  { %2337 = vrcp.f32 %v1076_v54  ;;  %v2379_v54 = vld [vmem:[#allocation7 + $0x80] ss:$12 sps:$4 sm:$0xff]  }
 0x54e   :  { %v2336_v6 = vpop.eup %2335 }
 0x54f   :  { %v1080_v63 = vmul.f32 %v2336_v6, %v1079_v57  ;;  %v2380_v57 = vld [vmem:[#allocation7 + $0x64] ss:$12 sps:$4 sm:$0xff]   ;;  %v2382_v6 = vld [vmem:[#allocation7 + $0x68] ss:$12 sps:$4 sm:$0xff]  }
 0x550   :  { %v2338_v62 = vpop.eup %2337 }
 0x551   :  { %v1081_v1 = vadd.f32 %v1080_v63, %v2847_v50  ;;  %v1083_v11 = vsub.f32 1.0, %v2338_v62  ;;  %v1085_v60 = vmul.f32 %v2338_v62, %v2999_v2  ;;  %v2383_v63 = vld [vmem:[#allocation7 + $0x4c] ss:$12 sps:$4 sm:$0xff]   ;;  %v2385_v62 = vld [vmem:[#allocation7 + $0x50] ss:$12 sps:$4 sm:$0xff]  }
 0x553   :  { %2339 = vtanh.f32 %v1081_v1  ;;  %v2384_v1 = vld [vmem:[#allocation7 + $0x48] ss:$12 sps:$4 sm:$0xff]  }
 0x560   :  { %v2340_v18 = vpop.eup %2339 }
 0x561   :  { %v1084_v42 = vmul.f32 %v2340_v18, %v1083_v11  ;;  %v2387_v11 = vld [vmem:[#allocation7 + $0x30] ss:$12 sps:$4 sm:$0xff]   ;;  %v2388_v18 = vld [vmem:[#allocation7 + $0x38] ss:$12 sps:$4 sm:$0xff]  }
 0x563   :  { %v3047_v51 = vadd.f32 %v1085_v60, %v1084_v42  ;;  %v2389_v42 = vld [vmem:[#allocation7 + $0x1c] ss:$12 sps:$4 sm:$0xff]   ;;  %v2390_v60 = vld [vmem:[#allocation7 + $0x18] ss:$12 sps:$4 sm:$0xff]  }
 0x565   :  { %v1087_v3 = vpack.c.bf16 %v3047_v51, %v3047_v51  ;;  %v1405_v50 = vsel %vm1401_vm2, %v2999_v2, %v3047_v51  ;;  %v1406_v0 = vsel %vm1401_vm2, %v3047_v51, %v2999_v2 }
 0x566   :  { %1413 = vst [vmem:[#allocation13 + $0x18] sm:$0xff] %v1405_v50  ;;  %1414 = vst [vmem:[#allocation13 + $0x20] sm:$0xff] %v1406_v0  ;;  %v2392_v50 = vld [vmem:[#allocation7] ss:$12 sps:$4 sm:$0xff]  }
 0x567   :  { %1121 = vmatmul.mubr.bf16.vlgmr.msra.gmra.mxu0 %v1087_v3  ;;  %2074 = vmatmul.mubr.bf16.vlgmr.msra.gmra.mxu1 %v1087_v3  ;;  %v2391_v3 = vld [vmem:[#allocation7 + $0x4] ss:$12 sps:$4 sm:$0xff]  }
 0x568   :  { %1193 = vmatpush1.bf16.msra.mxu0 %v3059_v13  ;;  %2078 = vmatpush3.bf16.msra.mxu1 %v2712_v24 }
 0x569   :  { %1194 = vmatprep.subr.bf16.mxu0 %v3063_v14  ;;  %2079 = vmatprep.subr.bf16.mxu1 %v3259_v59 }
 0x56a   :  { %1224 = vmatprep.mubr.bf16.mxu0 %v3260_v4  ;;  %2093 = vmatprep.mubr.msk.bf16.mxu1 %vm2580_vm1, %v3259_v59 }
 0x56c   :  { %1195 = vmatpush1.bf16.msra.mxu0 %v2692_v16  ;;  %2080 = vmatpush3.bf16.msra.mxu1 %v2723_v29  ;;  %v2373_v16 = vld [vmem:[#allocation7 + $0xac] ss:$12 sps:$4 sm:$0xff]  }
 0x56d   :  { %1196 = vmatprep.subr.bf16.mxu0 %v2696_v17  ;;  %2081 = vmatprep.subr.bf16.mxu1 %v3259_v59 }
 0x570   :  { %1197 = vmatpush1.bf16.msra.mxu0 %v2699_v20  ;;  %2082 = vmatpush3.bf16.msra.mxu1 %v2736_v32 }
 0x571   :  { %1198 = vmatprep.subr.bf16.mxu0 %v2702_v21  ;;  %2083 = vmatprep.subr.bf16.mxu1 %v3259_v59 }
 0x574   :  { %1199 = vmatpush1.bf16.msra.mxu0 %v2705_v22  ;;  %2084 = vmatpush3.bf16.msra.mxu1 %v2747_v36 }
 0x575   :  { %1200 = vmatprep.subr.bf16.mxu0 %v2709_v23  ;;  %2085 = vmatprep.subr.bf16.mxu1 %v3259_v59 }
 0x578   :  { %1201 = vmatpush1.bf16.msra.mxu0 %v2716_v27  ;;  %2086 = vmatpush3.bf16.msra.mxu1 %v2759_v38 }
 0x579   :  { %1202 = vmatprep.subr.bf16.mxu0 %v2720_v28  ;;  %2087 = vmatprep.subr.bf16.mxu1 %v3259_v59 }
 0x57c   :  { %1203 = vmatpush1.bf16.msra.mxu0 %v2729_v30  ;;  %2088 = vmatpush3.bf16.msra.mxu1 %v2764_v39 }
 0x57d   :  { %1204 = vmatprep.subr.bf16.mxu0 %v2733_v31  ;;  %2089 = vmatprep.subr.bf16.mxu1 %v3259_v59 }
 0x580   :  { %1205 = vmatpush1.bf16.msra.mxu0 %v2740_v34  ;;  %2090 = vmatpush3.bf16.msra.mxu1 %v2772_v40 }
 0x581   :  { %1206 = vmatprep.subr.bf16.mxu0 %v2744_v35  ;;  %2091 = vmatprep.subr.bf16.mxu1 %v3259_v59 }
 0x584   :  { %1207 = vmatpush1.bf16.msra.mxu0 %v2754_v37  ;;  %2092 = vmatpush3.bf16.msra.mxu1 %v2778_v41 }
 0x585   :  { %1296 = vmatprep.subr.bf16.mxu0 %v2373_v16  ;;  %2097 = vmatprep.subr.bf16.mxu1 %v3259_v59 }
 0x627   :  { %v1122_v17 = vpop.f32.mrf.mxu0  ;;  %v1163_v20 = vpop.f32.mrf.mxu1 }
 0x628   :  { %v1169_v21 = vadd.f32 %v1122_v17, %v2841_v19  ;;  %v1183_v38 = vadd.f32 %v2864_v49, %v1163_v20 }
 0x629   :  { %v1124_v22 = vpop.f32.mrf.mxu0  ;;  %v2075_v23 = vpop.f32.mrf.mxu1 }
 0x62a   :  { %v1801_v24 = vmul.f32 -1.442695, %v1169_v21  ;;  %v1176_v31 = vadd.f32 %v1124_v22, %v2845_v44 }
 0x62b   :  { %v1126_v27 = vpop.f32.mrf.mxu0  ;;  %v1166_v28 = vpop.f32.mrf.mxu1 }
 0x62c   :  { %2341 = vpow2.f32 %v1801_v24  ;;  %v1802_v32 = vmul.f32 -1.442695, %v1176_v31  ;;  %v3262_v24 = vld [vmem:[#allocation24_spill] sm:$0xff] }
 0x62d   :  { %v1127_v29 = vpop.f32.mrf.mxu0  ;;  %v2076_v30 = vpop.f32.mrf.mxu1 }
 0x62e   :  { %2343 = vpow2.f32 %v1802_v32 }
 0x639   :  { %v2342_v34 = vpop.eup %2341 }
 0x63a   :  { %v1173_v35 = vadd.f32 1.0, %v2342_v34 }
 0x63b   :  { %v2344_v36 = vpop.eup %2343 }
 0x63c   :  { %2345 = vrcp.f32 %v1173_v35  ;;  %v1180_v37 = vadd.f32 1.0, %v2344_v36  ;;  %v3263_v35 = vld [vmem:[#allocation22_spill] sm:$0xff] }
 0x63e   :  { %2347 = vrcp.f32 %v1180_v37 }
 0x649   :  { %v2346_v39 = vpop.eup %2345 }
 0x64a   :  { %v1184_v19 = vmul.f32 %v2346_v39, %v1183_v38 }
 0x64b   :  { %v2348_v47 = vpop.eup %2347 }
 0x64c   :  { %v1185_v9 = vadd.f32 %v1184_v19, %v2855_v5  ;;  %v1187_v8 = vsub.f32 1.0, %v2348_v47  ;;  %v1189_v44 = vmul.f32 %v2348_v47, %v3047_v51 }
 0x64e   :  { %2349 = vtanh.f32 %v1185_v9 }
 0x65b   :  { %v2350_v25 = vpop.eup %2349 }
 0x65c   :  { %v1188_v43 = vmul.f32 %v2350_v25, %v1187_v8 }
 0x65e   :  { %v3102_v12 = vadd.f32 %v1189_v44, %v1188_v43  ;;  %v1441_v43 = vld [vmem:[#allocation8 + $0x78] sm:$0xff]  ;;  %v1440_v44 = vld [vmem:[#allocation8 + $0x70] sm:$0xff] }
 0x660   :  { %v1191_v26 = vpack.c.bf16 %v3102_v12, %v3102_v12  ;;  %v1404_v61 = vsel %vm1401_vm2, %v2955_v48, %v3102_v12  ;;  %v1407_v5 = vsel %vm1401_vm2, %v3102_v12, %v2955_v48 }
 0x661   :  { %1412 = vst [vmem:[#allocation13 + $0x10] sm:$0xff] %v1404_v61  ;;  %1415 = vst [vmem:[#allocation13 + $0x28] sm:$0xff] %v1407_v5  ;;  %v1438_v61 = vld [vmem:[#allocation8 + $0x60] sm:$0xff]  ;;  %v1437_v5 = vld [vmem:[#allocation8 + $0x58] sm:$0xff] }
 0x662   :  { %1225 = vmatmul.mubr.bf16.vlgmr.msra.gmra.mxu0 %v1191_v26  ;;  %2094 = vmatmul.mubr.bf16.vlgmr.msra.gmra.mxu1 %v1191_v26  ;;  %v1439_v26 = vld [vmem:[#allocation8 + $0x68] sm:$0xff] }
 0x663   :  { %1297 = vmatpush1.bf16.msra.mxu0 %v3059_v13  ;;  %2098 = vmatpush3.bf16.msra.mxu1 %v2374_v52  ;;  %v1436_v52 = vld [vmem:[#allocation8 + $0x50] sm:$0xff] }
 0x664   :  { %1298 = vmatprep.subr.bf16.mxu0 %v3063_v14  ;;  %2099 = vmatprep.subr.bf16.mxu1 %v3259_v59 }
 0x665   :  { %1328 = vmatprep.mubr.bf16.mxu0 %v3260_v4  ;;  %2113 = vmatprep.mubr.msk.bf16.mxu1 %vm2580_vm1, %v3259_v59  ;;  %v2381_v4 = vld [vmem:[#allocation7 + $0x60] ss:$12 sps:$4 sm:$0xff]  }
 0x667   :  { %1299 = vmatpush1.bf16.msra.mxu0 %v2375_v7  ;;  %2100 = vmatpush3.bf16.msra.mxu1 %v2376_v45  ;;  %v1435_v7 = vld [vmem:[#allocation8 + $0x48] sm:$0xff]  ;;  %v1434_v45 = vld [vmem:[#allocation8 + $0x40] sm:$0xff] }
 0x668   :  { %1300 = vmatprep.subr.bf16.mxu0 %v2377_v10  ;;  %2101 = vmatprep.subr.bf16.mxu1 %v3259_v59  ;;  %v1433_v10 = vld [vmem:[#allocation8 + $0x38] sm:$0xff] }
 0x66b   :  { %1301 = vmatpush1.bf16.msra.mxu0 %v2378_v58  ;;  %2102 = vmatpush3.bf16.msra.mxu1 %v2379_v54  ;;  %v1432_v58 = vld [vmem:[#allocation8 + $0x30] sm:$0xff]  ;;  %v1431_v54 = vld [vmem:[#allocation8 + $0x28] sm:$0xff] }
 0x66c   :  { %1302 = vmatprep.subr.bf16.mxu0 %v2380_v57  ;;  %2103 = vmatprep.subr.bf16.mxu1 %v3259_v59  ;;  %v1430_v57 = vld [vmem:[#allocation8 + $0x20] sm:$0xff] }
 0x66f   :  { %1303 = vmatpush1.bf16.msra.mxu0 %v2381_v4  ;;  %2104 = vmatpush3.bf16.msra.mxu1 %v2382_v6  ;;  %v1429_v4 = vld [vmem:[#allocation8 + $0x18] sm:$0xff]  ;;  %v1428_v6 = vld [vmem:[#allocation8 + $0x10] sm:$0xff] }
 0x670   :  { %1304 = vmatprep.subr.bf16.mxu0 %v2383_v63  ;;  %2105 = vmatprep.subr.bf16.mxu1 %v3259_v59  ;;  %v1427_v63 = vld [vmem:[#allocation8 + $0x8] sm:$0xff] }
 0x673   :  { %1305 = vmatpush1.bf16.msra.mxu0 %v2384_v1  ;;  %2106 = vmatpush3.bf16.msra.mxu1 %v2385_v62  ;;  %v1426_v1 = vld [vmem:[#allocation8] sm:$0xff]  ;;  %v1535_v62 = vld [vmem:[#allocation10 + $0x78] sm:$0xff] }
 0x674   :  { %1306 = vmatprep.subr.bf16.mxu0 %v2386_v55  ;;  %2107 = vmatprep.subr.bf16.mxu1 %v3259_v59  ;;  %v1534_v55 = vld [vmem:[#allocation10 + $0x70] sm:$0xff] }
 0x677   :  { %1307 = vmatpush1.bf16.msra.mxu0 %v2387_v11  ;;  %2108 = vmatpush3.bf16.msra.mxu1 %v2388_v18  ;;  %v1533_v11 = vld [vmem:[#allocation10 + $0x68] sm:$0xff]  ;;  %v1532_v18 = vld [vmem:[#allocation10 + $0x60] sm:$0xff] }
 0x678   :  { %1308 = vmatprep.subr.bf16.mxu0 %v2389_v42  ;;  %2109 = vmatprep.subr.bf16.mxu1 %v3259_v59  ;;  %v1531_v42 = vld [vmem:[#allocation10 + $0x58] sm:$0xff] }
 0x67b   :  { %1309 = vmatpush1.bf16.msra.mxu0 %v2390_v60  ;;  %2110 = vmatpush3.bf16.msra.mxu1 %v2772_v40  ;;  %v1530_v60 = vld [vmem:[#allocation10 + $0x50] sm:$0xff] }
 0x67c   :  { %1310 = vmatprep.subr.bf16.mxu0 %v2391_v3  ;;  %2111 = vmatprep.subr.bf16.mxu1 %v3259_v59  ;;  %v1529_v3 = vld [vmem:[#allocation10 + $0x48] sm:$0xff] }
 0x67f   :  { %1311 = vmatpush1.bf16.msra.mxu0 %v2392_v50  ;;  %2112 = vmatpush3.bf16.msra.mxu1 %v2778_v41  ;;  %v1528_v50 = vld [vmem:[#allocation10 + $0x40] sm:$0xff] }
 0x680   :  { %2117 = vmatprep.subr.mxu0 %v3259_v59  ;;  %2152 = vmatprep.subr.mxu1 %v3259_v59 }
 0x722   :  { %v1226_v0 = vpop.f32.mrf.mxu0  ;;  %v1267_v13 = vpop.f32.mrf.mxu1 }
 0x723   :  { %v1273_v14 = vadd.f32 %v1226_v0, %v2849_v53  ;;  %v1287_v32 = vadd.f32 %v2864_v49, %v1267_v13  ;;  %v1527_v0 = vld [vmem:[#allocation10 + $0x38] sm:$0xff]  ;;  %v1526_v13 = vld [vmem:[#allocation10 + $0x30] sm:$0xff] }
 0x724   :  { %v1228_v16 = vpop.f32.mrf.mxu0  ;;  %v2095_v17 = vpop.f32.mrf.mxu1 }
 0x725   :  { %v1803_v20 = vmul.f32 -1.442695, %v1273_v14  ;;  %v1280_v27 = vadd.f32 %v1228_v16, %v3262_v24  ;;  %v1525_v14 = vld [vmem:[#allocation10 + $0x28] sm:$0xff]  ;;  %v1524_v16 = vld [vmem:[#allocation10 + $0x20] sm:$0xff]  ;;  %v1523_v17 = vld [vmem:[#allocation10 + $0x18] sm:$0xff] }
 0x726   :  { %v1230_v40 = vpop.f32.mrf.mxu0  ;;  %v1270_v21 = vpop.f32.mrf.mxu1 }
 0x727   :  { %2351 = vpow2.f32 %v1803_v20  ;;  %v1804_v28 = vmul.f32 -1.442695, %v1280_v27  ;;  %v3264_v21 = vld [vmem:[#allocation25_spill] sm:$0xff] }
 0x728   :  { %v1231_v22 = vpop.f32.mrf.mxu0  ;;  %v2096_v23 = vpop.f32.mrf.mxu1 }
 0x729   :  { %2353 = vpow2.f32 %v1804_v28 }
 0x734   :  { %v2352_v41 = vpop.eup %2351 }
 0x735   :  { %v1277_v29 = vadd.f32 1.0, %v2352_v41 }
 0x736   :  { %v2354_v30 = vpop.eup %2353 }
 0x737   :  { %2355 = vrcp.f32 %v1277_v29  ;;  %v1284_v31 = vadd.f32 1.0, %v2354_v30 }
 0x739   :  { %2357 = vrcp.f32 %v1284_v31 }
 0x744   :  { %v2356_v53 = vpop.eup %2355 }
 0x745   :  { %v1288_v34 = vmul.f32 %v2356_v53, %v1287_v32 }
 0x746   :  { %v2358_v37 = vpop.eup %2357 }
 0x747   :  { %v1289_v36 = vadd.f32 %v1288_v34, %v3263_v35  ;;  %v1291_v38 = vsub.f32 1.0, %v2358_v37  ;;  %v1293_v9 = vmul.f32 %v2358_v37, %v3102_v12  ;;  %v2393_v37 = vld [vmem:[%s3241_s4] ss:$0 sm:$0xff] }
 0x749   :  { %2359 = vtanh.f32 %v1289_v36 }
 0x756   :  { %v2360_v39 = vpop.eup %2359 }
 0x757   :  { %v1292_v19 = vmul.f32 %v2360_v39, %v1291_v38 }
 0x759   :  { %v3135_v47 = vadd.f32 %v1293_v9, %v1292_v19  ;;  %v3265_v9 = vld [vmem:[#allocation23_spill] sm:$0xff] }
 0x75b   :  { %v1295_v8 = vpack.c.bf16 %v3135_v47, %v3135_v47  ;;  %v1403_v49 = vsel %vm1401_vm2, %v2911_v56, %v3135_v47  ;;  %v1408_v25 = vsel %vm1401_vm2, %v3135_v47, %v2911_v56 }
 0x75c   :  { %1411 = vst [vmem:[#allocation13 + $0x8] sm:$0xff] %v1403_v49  ;;  %1416 = vst [vmem:[#allocation13 + $0x30] sm:$0xff] %v1408_v25 }
 0x75d   :  { %1329 = vmatmul.mubr.bf16.vlgmr.msra.gmra.mxu0 %v1295_v8  ;;  %2114 = vmatmul.mubr.bf16.vlgmr.msra.gmra.mxu1 %v1295_v8 }
 0x75e   :  { %2149 = vmatprep.mubr.msk.f32.mxu0 %vm2580_vm1, %v3259_v59  ;;  %2184 = vmatprep.mubr.msk.f32.mxu1 %vm2580_vm1, %v3259_v59 }
 0x75f   :  { %2118 = vmatpush3.msra.mxu0 %v1441_v43  ;;  %2153 = vmatpush3.msra.mxu1 %v1535_v62  ;;  %v1621_v62 = vld [vmem:[#allocation11 + $0x38] sm:$0xff] }
 0x760   :  { %2119 = vmatprep.subr.mxu0 %v3259_v59  ;;  %2154 = vmatprep.subr.mxu1 %v3259_v59 }
 0x761   :  { %2120 = vmatpush3.msra.mxu0 %v1440_v44  ;;  %2155 = vmatpush3.msra.mxu1 %v1534_v55  ;;  %v1620_v55 = vld [vmem:[#allocation11 + $0x30] sm:$0xff] }
 0x762   :  { %2121 = vmatprep.subr.mxu0 %v3259_v59  ;;  %2156 = vmatprep.subr.mxu1 %v3259_v59 }
 0x763   :  { %2122 = vmatpush3.msra.mxu0 %v1439_v26  ;;  %2157 = vmatpush3.msra.mxu1 %v1533_v11  ;;  %v1619_v11 = vld [vmem:[#allocation11 + $0x28] sm:$0xff] }
 0x764   :  { %2123 = vmatprep.subr.mxu0 %v3259_v59  ;;  %2158 = vmatprep.subr.mxu1 %v3259_v59 }
 0x765   :  { %2124 = vmatpush3.msra.mxu0 %v1438_v61  ;;  %2159 = vmatpush3.msra.mxu1 %v1532_v18  ;;  %v1618_v18 = vld [vmem:[#allocation11 + $0x20] sm:$0xff] }
 0x766   :  { %2125 = vmatprep.subr.mxu0 %v3259_v59  ;;  %2160 = vmatprep.subr.mxu1 %v3259_v59 }
 0x767   :  { %2126 = vmatpush3.msra.mxu0 %v1437_v5  ;;  %2161 = vmatpush3.msra.mxu1 %v1531_v42  ;;  %v1617_v42 = vld [vmem:[#allocation11 + $0x18] sm:$0xff] }
 0x768   :  { %2127 = vmatprep.subr.mxu0 %v3259_v59  ;;  %2162 = vmatprep.subr.mxu1 %v3259_v59 }
 0x769   :  { %2128 = vmatpush3.msra.mxu0 %v1436_v52  ;;  %2163 = vmatpush3.msra.mxu1 %v1530_v60  ;;  %v1807_v60 = vld [vmem:[%s3243_s6] ss:$0 sm:$0xff]  ;;  %s2581_s6 = smov [#allocation13]  }
 0x76a   :  { %2129 = vmatprep.subr.mxu0 %v3259_v59  ;;  %2164 = vmatprep.subr.mxu1 %v3259_v59  ;;  %s1713_s26 = sshll.u32 %s2581_s6, 4  ;;  %s1714_s26 = int_to_ptr.vmem [resolvable:$true] %s1713_s26 }
 0x76b   :  { %2130 = vmatpush3.msra.mxu0 %v1435_v7  ;;  %2165 = vmatpush3.msra.mxu1 %v1529_v3  ;;  %s2514_s5 = scalar_lea.vmem %s1714_s26, 1024  ;;  %p2519_p3 = scmp.lt.s32.totalorder %s1714_s26, %s1714_s26 }
 0x76c   :  { %2131 = vmatprep.subr.mxu0 %v3259_v59  ;;  %2166 = vmatprep.subr.mxu1 %v3259_v59  ;;  %p2515_p2 = scmp.ne.s32.totalorder %s1714_s26, %s2514_s5  ;;  %p2520_p4 = scmp.lt.s32.totalorder %s2514_s5, %s2514_s5 }
 0x76d   :  { %2132 = vmatpush3.msra.mxu0 %v1434_v45  ;;  %2167 = vmatpush3.msra.mxu1 %v1528_v50 }
 0x76e   :  { %2133 = vmatprep.subr.mxu0 %v3259_v59  ;;  %2168 = vmatprep.subr.mxu1 %v3259_v59  ;;  %p2521_p5 = por %p2520_p4, %p2519_p3 }
 0x76f   :  { %2134 = vmatpush3.msra.mxu0 %v1433_v10  ;;  %2169 = vmatpush3.msra.mxu1 %v1527_v0 }
 0x770   :  { %2135 = vmatprep.subr.mxu0 %v3259_v59  ;;  %2170 = vmatprep.subr.mxu1 %v3259_v59  ;;  %p2522_p6 = pnand %p2521_p5, %p2515_p2 }
 0x771   :  { %2136 = vmatpush3.msra.mxu0 %v1432_v58  ;;  %2171 = vmatpush3.msra.mxu1 %v1526_v13  ;;  %v1520_v58 = vld [vmem:[#allocation10] sm:$0xff] }
 0x772   :  { %2137 = vmatprep.subr.mxu0 %v3259_v59  ;;  %2172 = vmatprep.subr.mxu1 %v3259_v59 }
 0x773   :  { %2138 = vmatpush3.msra.mxu0 %v1431_v54  ;;  %2173 = vmatpush3.msra.mxu1 %v1525_v14  ;;  %v1627_v54 = vld [vmem:[#allocation11 + $0x68] sm:$0xff]  ;;  %v1616_v14 = vld [vmem:[#allocation11 + $0x10] sm:$0xff] }
 0x774   :  { %2139 = vmatprep.subr.mxu0 %v3259_v59  ;;  %2174 = vmatprep.subr.mxu1 %v3259_v59 }
 0x775   :  { %2140 = vmatpush3.msra.mxu0 %v1430_v57  ;;  %2175 = vmatpush3.msra.mxu1 %v1524_v16  ;;  %v1626_v57 = vld [vmem:[#allocation11 + $0x60] sm:$0xff]  ;;  %v1615_v16 = vld [vmem:[#allocation11 + $0x8] sm:$0xff] }
 0x776   :  { %2141 = vmatprep.subr.mxu0 %v3259_v59  ;;  %2176 = vmatprep.subr.mxu1 %v3259_v59 }
 0x777   :  { %2142 = vmatpush3.msra.mxu0 %v1429_v4  ;;  %2177 = vmatpush3.msra.mxu1 %v1523_v17  ;;  %v1625_v4 = vld [vmem:[#allocation11 + $0x58] sm:$0xff]  ;;  %v1614_v17 = vld [vmem:[#allocation11] sm:$0xff] }
 0x778   :  { %2143 = vmatprep.subr.mxu0 %v3259_v59  ;;  %2178 = vmatprep.subr.mxu1 %v3259_v59 }
 0x779   :  { %2144 = vmatpush3.msra.mxu0 %v1428_v6  ;;  %v1624_v6 = vld [vmem:[#allocation11 + $0x50] sm:$0xff] }
 0x77a   :  { %2145 = vmatprep.subr.mxu0 %v3259_v59 }
 0x77b   :  { %2146 = vmatpush3.msra.mxu0 %v1427_v63  ;;  %v1623_v63 = vld [vmem:[#allocation11 + $0x48] sm:$0xff] }
 0x77c   :  { %2147 = vmatprep.subr.mxu0 %v3259_v59 }
 0x77d   :  { %2148 = vmatpush3.msra.mxu0 %v1426_v1  ;;  %v1622_v1 = vld [vmem:[#allocation11 + $0x40] sm:$0xff] }
 0x77e   :  { %2187 = vmatprep.subr.mxu0 %v3259_v59 }
 0x81d   :  { %v1330_v20 = vpop.f32.mrf.mxu0  ;;  %v1371_v40 = vpop.f32.mrf.mxu1 }
 0x81e   :  { %v1377_v22 = vadd.f32 %v1330_v20, %v3264_v21  ;;  %v1391_v38 = vadd.f32 %v2393_v37, %v1371_v40  ;;  %v1808_v20 = vld [vmem:[%s3245_s8] ss:$0 sm:$0xff] }
 0x81f   :  { %v1332_v23 = vpop.f32.mrf.mxu0  ;;  %v2115_v24 = vpop.f32.mrf.mxu1 }
 0x820   :  { %v1805_v27 = vmul.f32 -1.442695, %v1377_v22  ;;  %v1384_v31 = vadd.f32 %v1332_v23, %v2859_v15  ;;  %v1418_v15 = vadd.f32 %v2911_v56, %v2867_v33 }
 0x821   :  { %v1334_v28 = vpop.f32.mrf.mxu0  ;;  %v1374_v41 = vpop.f32.mrf.mxu1 }
 0x822   :  { %2361 = vpow2.f32 %v1805_v27  ;;  %v1806_v32 = vmul.f32 -1.442695, %v1384_v31  ;;  %v1419_v49 = vadd.f32 %v1418_v15, %v2955_v48 }
 0x823   :  { %v1335_v29 = vpop.f32.mrf.mxu0  ;;  %v2116_v30 = vpop.f32.mrf.mxu1 }
 0x824   :  { %2363 = vpow2.f32 %v1806_v32  ;;  %v1420_v43 = vadd.f32 %v1419_v49, %v2999_v2 }
 0x826   :  { %v1421_v26 = vadd.f32 %v1420_v43, %v3047_v51 }
 0x828   :  { %v1422_v7 = vadd.f32 %v1421_v26, %v3102_v12  ;;  %v1522_v12 = vld [vmem:[#allocation10 + $0x10] sm:$0xff] }
 0x829   :  { %2179 = vmatpush3.msra.mxu1 %v1522_v12 }
 0x82a   :  { %v1423_v10 = vadd.f32 %v1422_v7, %v3135_v47  ;;  %2180 = vmatprep.subr.mxu1 %v3259_v59 }
 0x82f   :  { %v2362_v53 = vpop.eup %2361 }
 0x830   :  { %v1381_v34 = vadd.f32 1.0, %v2362_v53 }
 0x831   :  { %v2364_v35 = vpop.eup %2363 }
 0x832   :  { %2365 = vrcp.f32 %v1381_v34  ;;  %v1388_v36 = vadd.f32 1.0, %v2364_v35 }
 0x834   :  { %2367 = vrcp.f32 %v1388_v36 }
 0x83f   :  { %v2366_v39 = vpop.eup %2365 }
 0x840   :  { %v1392_v19 = vmul.f32 %v2366_v39, %v1391_v38 }
 0x841   :  { %v2368_v25 = vpop.eup %2367 }
 0x842   :  { %v1393_v8 = vadd.f32 %v1392_v19, %v3265_v9  ;;  %v1395_v44 = vsub.f32 1.0, %v2368_v25  ;;  %v1397_v52 = vmul.f32 %v2368_v25, %v3135_v47  ;;  %v1521_v47 = vld [vmem:[#allocation10 + $0x8] sm:$0xff] }
 0x843   :  { %2181 = vmatpush3.msra.mxu1 %v1521_v47 }
 0x844   :  { %2369 = vtanh.f32 %v1393_v8  ;;  %2182 = vmatprep.subr.mxu1 %v3259_v59 }
 0x845   :  { %2183 = vmatpush3.msra.mxu1 %v1520_v58 }
 0x851   :  { %v2370_v61 = vpop.eup %2369 }
 0x852   :  { %v1396_v5 = vmul.f32 %v2370_v61, %v1395_v44 }
 0x854   :  { %v1398_v45 = vadd.f32 %v1397_v52, %v1396_v5 }
 0x856   :  { %v1402_v56 = vsel %vm1401_vm2, %v2867_v33, %v1398_v45  ;;  %v1409_v48 = vsel %vm1401_vm2, %v1398_v45, %v2867_v33  ;;  %v1424_v2 = vadd.f32 %v1423_v10, %v1398_v45  ;;  %v1628_v33 = vld [vmem:[#allocation11 + $0x70] sm:$0xff] }
 0x857   :  { %1410 = vst [vmem:[#allocation13] sm:$0xff] %v1402_v56  ;;  %1417 = vst [vmem:[#allocation13 + $0x38] sm:$0xff] %v1409_v48 }
 0x858   :  { %v1425_v51 = vmul.f32 0.125, %v1424_v2 }
 0x85a   :  { %2150 = vmatmul.mubr.f32.vlgmr.msra.gmra.mxu0 %v1425_v51 }
 0x85b   :  { %2219 = vmatprep.mubr.msk.f32.mxu0 %vm2580_vm1, %v3259_v59  ;;  %2188 = vmatpush3.msra.mxu0 %v1629_v46 }
 0x85c   :  { %2189 = vmatprep.subr.mxu0 %v3259_v59 }
 0x85d   :  { %2190 = vmatpush3.msra.mxu0 %v1628_v33 }
 0x85e   :  { %2191 = vmatprep.subr.mxu0 %v3259_v59 }
 0x85f   :  { %2192 = vmatpush3.msra.mxu0 %v1627_v54 }
 0x860   :  { %2193 = vmatprep.subr.mxu0 %v3259_v59 }
 0x861   :  { %2194 = vmatpush3.msra.mxu0 %v1626_v57 }
 0x862   :  { %2195 = vmatprep.subr.mxu0 %v3259_v59 }
 0x863   :  { %2196 = vmatpush3.msra.mxu0 %v1625_v4 }
 0x864   :  { %2197 = vmatprep.subr.mxu0 %v3259_v59 }
 0x865   :  { %2198 = vmatpush3.msra.mxu0 %v1624_v6 }
 0x866   :  { %2199 = vmatprep.subr.mxu0 %v3259_v59 }
 0x867   :  { %2200 = vmatpush3.msra.mxu0 %v1623_v63 }
 0x868   :  { %2201 = vmatprep.subr.mxu0 %v3259_v59 }
 0x869   :  { %2202 = vmatpush3.msra.mxu0 %v1622_v1 }
 0x86a   :  { %2203 = vmatprep.subr.mxu0 %v3259_v59 }
 0x86b   :  { %2204 = vmatpush3.msra.mxu0 %v1621_v62 }
 0x86c   :  { %2205 = vmatprep.subr.mxu0 %v3259_v59 }
 0x86d   :  { %2206 = vmatpush3.msra.mxu0 %v1620_v55 }
 0x86e   :  { %2207 = vmatprep.subr.mxu0 %v3259_v59 }
 0x86f   :  { %2208 = vmatpush3.msra.mxu0 %v1619_v11 }
 0x870   :  { %2209 = vmatprep.subr.mxu0 %v3259_v59 }
 0x871   :  { %2210 = vmatpush3.msra.mxu0 %v1618_v18 }
 0x872   :  { %2211 = vmatprep.subr.mxu0 %v3259_v59 }
 0x873   :  { %2212 = vmatpush3.msra.mxu0 %v1617_v42 }
 0x874   :  { %2213 = vmatprep.subr.mxu0 %v3259_v59 }
 0x875   :  { %2214 = vmatpush3.msra.mxu0 %v1616_v14 }
 0x876   :  { %2215 = vmatprep.subr.mxu0 %v3259_v59 }
 0x877   :  { %2216 = vmatpush3.msra.mxu0 %v1615_v16 }
 0x878   :  { %2217 = vmatprep.subr.mxu0 %v3259_v59 }
 0x879   :  { %2218 = vmatpush3.msra.mxu0 %v1614_v17 }
 0x91a   :  { %v1515_v3 = vpop.f32.mrf.mxu0 }
 0x91b   :  { %v1516_v50 = vadd.f32 %v1807_v60, %v1515_v3 }
 0x91c   :  { %v2151_v0 = vpop.f32.mrf.mxu0 }
 0x91d   :  { %v1519_v13 = vmax.f32 %v1516_v50, 0.0 }
 0x91f   :  { %2185 = vmatmul.mubr.f32.vlgmr.msra.gmra.mxu1 %v1519_v13 }
 0x9df   :  { %v1609_v40 = vpop.f32.mrf.mxu1 }
 0x9e0   :  { %v1610_v21 = vadd.f32 %v1808_v20, %v1609_v40 }
 0x9e1   :  { %v2186_v22 = vpop.f32.mrf.mxu1 }
 0x9e2   :  { %v1613_v23 = vmax.f32 %v1610_v21, 0.0 }
 0x9e4   :  { %2220 = vmatmul.mubr.f32.vlgmr.msra.gmra.mxu0 %v1613_v23 }
 0x9e5   :  { %2525 = shalt.err (!%p2522_p6)
}
 0x9e6   :  { %1719 = dma.vmem_to_hbm [thread:$0]  %s1714_s26, 1024, %s3248_s11, [#allocation4], %s2570_s13, %s2570_s13, %s2571_s14  }
 0x9e7   :  { %v1809_v59 = vld [vmem:[%s3247_s10] ss:$0 sm:$0xff]  ;;  %s2582_s30 = smov [#allocation14]  }
 0x9e8   :  { %s1726_s0 = sshll.u32 %s2582_s30, 4  ;;  %s1727_s0 = int_to_ptr.vmem [resolvable:$true] %s1726_s0 }
 0x9e9   :  { %s2534_s15 = scalar_lea.vmem %s1727_s0, 128  ;;  %p2539_p8 = scmp.lt.s32.totalorder %s1727_s0, %s1727_s0 }
 0x9ea   :  { %p2535_p7 = scmp.ne.s32.totalorder %s1727_s0, %s2534_s15  ;;  %p2540_p9 = scmp.lt.s32.totalorder %s2534_s15, %s2534_s15 }
 0x9ec   :  { %p2541_p10 = por %p2540_p9, %p2539_p8 }
 0x9ee   :  { %p2542_p11 = pnand %p2541_p10, %p2535_p7 }
 0xaa4   :  { %v1703_v24 = vpop.f32.mrf.mxu0 }
 0xaa5   :  { %v1704_v27 = vadd.f32 %v1809_v59, %v1703_v24 }
 0xaa6   :  { %v2221_v28 = vpop.f32.mrf.mxu0 }
 0xaa7   :  { %1707 = vst [vmem:[#allocation14] sm:$0xff] %v1704_v27 }
 0xaa8   :  { %2545 = shalt.err (!%p2542_p11)
}
 0xaa9   :  { %1729 = dma.vmem_to_hbm [thread:$0]  %s1727_s0, 128, %s3249_s12, [#allocation15]  }
 0xaaa   :  { %2562 = dma.done.wait [#allocation4], 1024  }
 0xaab   :  { %2563 = vsyncadd [#allocation4], 4294966272 }
 0xaac   :  { %2564 = dma.done.wait [#allocation15], 128  }
 0xaad   :  { %2565 = vsyncadd [#allocation15], 4294967168 }
 0xaae   :  { %1736 = vsyncpa [#allocation3], 1 }
 0xaaf   :  { %1737 = vsyncpa [#allocation6], 1 }
 0xab0   :  { %1738 = vsyncpa [#allocation9], 1 }
 0xab1   :  { %1739 = vsyncpa [#allocation12], 1 }
 0xab2   :  { %1740 = vsyncpa [#allocation4], 1 }
 0xab3   :  { %1741 = vsyncpa [#allocation15], 1 }

</bundles_post_ra>
